<compile_context>
chip_gen: v7x
topology: tpu7x:2x2x1
jax: 0.10.0
libtpu: 0.0.40
codegen_flags: <defaults>
</compile_context>

<pallas_src>
import functools

import jax
import jax.numpy as jnp
from jax.experimental import pallas as pl
from jax.experimental.pallas import tpu as pltpu

# ----------------------- small, module-consistent configuration -----------------------
D = 32            # embedding_dim (768 for 'base' in the real module)
R = 4             # LoRA rank
NUM_HEADS = 2
NUM_BLOCKS = 4    # stands in for the 4 intermediate layers of decode_type='linear4'
PATCH = 14        # DINOv2 patch size
IMAGE_SHAPE = (56, 56)
N_BINS = 16       # 256 in the real module
UPSAMPLE = 4
MIN_DEPTH, MAX_DEPTH = 0.001, 150.0
CHANNELS = 8 * D  # embedding_dim * 8 for 'linear4'


def _round_up(x, m):
    return (x + m - 1) // m * m


def _tpu_vmem_capacity():
    # Trace-time hardware query; falls back to a v7x-sized (64 MiB) assumption if the
    # query is unavailable so the limits below stay conservative on every generation.
    try:
        return int(pltpu.get_tpu_info().vmem_capacity_bytes)
    except Exception:  # pragma: no cover - conservative fallback
        return 64 * 1024 * 1024


_VMEM_CAP = _tpu_vmem_capacity()
# Scoped-VMEM budget per generation: ~48 MiB on a 64 MiB v7x part (keeps double-buffering
# without spill), ~64 MiB on 128 MiB v5e/v6e parts where the depth kernel is HBM-bound.
_VMEM_LIMIT = int(min(64 * 1024 * 1024, _VMEM_CAP // 2 + 16 * 1024 * 1024))
# Deeper input pipelining on the depth-kernel feature slab only where VMEM allows (v5e/v6e);
# stay at 2 buffers on v7x's 64 MiB VMEM.
_FEAT_BUFFERS = 3 if _VMEM_CAP >= 100 * 1024 * 1024 else 2


# ===================== Pallas kernel 1: generic fused linear (x @ W + b) =====================
def _linear_kernel(x_ref, w_ref, b_ref, out_ref, *, activation):
    # x: (tm, D) bf16, w: (D, N) bf16, b: (1, N) f32, out: (tm, N) out_dtype
    y = jnp.dot(x_ref[...], w_ref[...], preferred_element_type=jnp.float32) + b_ref[...]
    if activation == "gelu":
        y = jax.nn.gelu(y)            # tanh-approx GELU -> EUP, free slot next to the MXU
    out_ref[...] = y.astype(out_ref.dtype)


def linear_pallas(x2d, w, b, *, activation=None, out_dtype=jnp.bfloat16, tm=512):
    """Tiled x @ W + b with optional fused GELU (bf16 MXU feed, f32 accumulate).

    Shared by the LoRA-folded qkv projection, the attention output projection and both MLP
    matmuls.  Token tiles are MXU-aligned multiples of 256 (v6e/v7x MXU rows, bf16 sublane
    pack; also a multiple of v5e's 128).  Grid-invariant weight/bias blocks are
    single-buffered so the second pipeline buffer's VMEM is not wasted.
    NOTE: at the toy sizes used below the grid collapses to 1 and launch overhead dominates;
    in production one would gate this path behind a row-count threshold and let XLA handle
    tiny matmuls."""
    m, d = x2d.shape
    n = w.shape[1]
    tm = max(256, min(tm, _round_up(m, 256)))
    m_pad = _round_up(m, tm)
    x_p = x2d if m_pad == m else jnp.pad(x2d, ((0, m_pad - m), (0, 0)))
    b2d = jnp.asarray(b, jnp.float32).reshape(1, n)

    out = pl.pallas_call(
        functools.partial(_linear_kernel, activation=activation),
        out_shape=jax.ShapeDtypeStruct((m_pad, n), out_dtype),
        grid=(m_pad // tm,),
        in_specs=[
            pl.BlockSpec((tm, d), lambda i: (i, 0)),                                   # x tile
            pl.BlockSpec((d, n), lambda i: (0, 0), pipeline_mode=pl.Buffered(1)),      # weight
            pl.BlockSpec((1, n), lambda i: (0, 0), pipeline_mode=pl.Buffered(1)),      # bias
        ],
        out_specs=pl.BlockSpec((tm, n), lambda i: (i, 0)),
        compiler_params=pltpu.CompilerParams(
            dimension_semantics=("parallel",),
            vmem_limit_bytes=_VMEM_LIMIT),
    )(x_p.astype(jnp.bfloat16), w.astype(jnp.bfloat16), b2d)
    return out[:m]


def lora_qkv(x2d, wqkv, bqkv, aq, bq, av, bv):
    """Faithful to `_LoRA_qkv.forward`: qkv(x); qkv[:, :D] += x@Aq@Bq; qkv[:, -D:] += x@Av@Bv.

    The rank-R LoRA deltas are folded into the qkv weight once per call (same linear map,
    slightly different fp summation order), so the kernel is a single tiled matmul.  The
    output is emitted in bf16 — q/k/v feed bf16 MXU einsums downstream anyway and the
    (m, 3D) writeback is halved."""
    d = x2d.shape[1]
    w_eff = wqkv.at[:, :d].add(aq @ bq).at[:, 2 * d:].add(av @ bv)
    return linear_pallas(x2d, w_eff, bqkv, out_dtype=jnp.bfloat16)


# ===================== Pallas kernel 2: decode_head_linear.depth_pred =====================
def _depth_pred_kernel(feat_ref, wt_ref, bias_ref, bins_ref, out_ref):
    # feat: (1, C, tm) bf16 patch-token channels; wt: (NB, C) bf16; bias: (1, NB, 1) f32
    # bins: (NB, 1) f32; out: (1, 1, tm) f32 -> one lane-dense row per grid step.
    # 1x1 conv as (NB, C) @ (C, tm); cls-channel + conv-bias contribution added per image.
    logit = jnp.dot(wt_ref[...], feat_ref[0], preferred_element_type=jnp.float32)
    logit = jnp.maximum(logit + bias_ref[0], 0.0) + 0.1          # relu + eps (norm 'linear')
    den = jnp.sum(logit, axis=0, keepdims=True)                  # (1, tm)
    num = jnp.sum(logit * bins_ref[...], axis=0, keepdims=True)  # (1, tm) = sum_k logit_k*bin_k
    # Exact division (kernel is HBM/MXU bound, EUP has slack) -> matches reference division.
    out_ref[0] = num / den


def depth_pred_pallas(feat_nchw, w_patch, cls_bias, bins, tm=1024):
    """feat_nchw: (B, C_patch, h, w) patch-token feature slab (cls channels removed, bf16),
    w_patch: (C_patch, NB) conv rows for the patch channels,
    cls_bias: (B, NB) = cls_channels @ W_cls + conv_bias (per-image constant),
    bins: (NB,) depth bin centers.  Returns (B, h, w) depth map."""
    b, c, hh, ww = feat_nchw.shape
    nb = w_patch.shape[1]
    hw = hh * ww

    # Lane-dense tile over spatial positions; tm <= 1024 keeps the double-buffered feat tile
    # well inside the 48 MiB v7x budget even at production C=3072.
    tm = max(128, min(tm, _round_up(hw, 128)))
    hw_pad = _round_up(hw, tm)
    n_tiles = hw_pad // tm

    feat = feat_nchw.reshape(b, c, hw)
    if hw_pad != hw:
        feat = jnp.pad(feat, ((0, 0), (0, 0), (0, hw_pad - hw)))
    wt = jnp.transpose(w_patch).astype(jnp.bfloat16)      # (NB, C)
    bias_col = cls_bias[:, :, None].astype(jnp.float32)   # (B, NB, 1)
    bins_col = bins.reshape(nb, 1).astype(jnp.float32)    # (NB, 1)

    out = pl.pallas_call(
        _depth_pred_kernel,
        # Per-tile output blocks: (image, tile) -> row bi*n_tiles + j.  Writeback is pipelined
        # per spatial tile (no per-image resident slab, no dynamic single-sublane stores).
        out_shape=jax.ShapeDtypeStruct((b * n_tiles, 1, tm), jnp.float32),
        grid=(b, n_tiles),
        in_specs=[
            pl.BlockSpec((1, c, tm), lambda bi, j: (bi, 0, j),
                         pipeline_mode=pl.Buffered(_FEAT_BUFFERS)),                    # feat tile
            pl.BlockSpec((nb, c), lambda bi, j: (0, 0),
                         pipeline_mode=pl.Buffered(1)),                                # conv weight
            pl.BlockSpec((1, nb, 1), lambda bi, j: (bi, 0, 0)),                        # per-image bias
            pl.BlockSpec((nb, 1), lambda bi, j: (0, 0),
                         pipeline_mode=pl.Buffered(1)),                                # bins
        ],
        out_specs=pl.BlockSpec((1, 1, tm), lambda bi, j: (bi * n_tiles + j, 0, 0)),
        compiler_params=pltpu.CompilerParams(
            dimension_semantics=("parallel", "parallel"),   # spatial axis is not a reduction
            vmem_limit_bytes=_VMEM_LIMIT),
    )(feat, wt, bias_col, bins_col)

    return out.reshape(b, hw_pad)[:, :hw].reshape(b, hh, ww)


# ============================ synthetic DINOv2-like backbone ============================
# TODO(synk): the real SurgicalDINO loads a pretrained DINOv2 ViT via torch.hub; a small
# deterministic ViT with the same LoRA-qkv structure stands in for it here.
def _layer_norm(x, g, b, eps=1e-6):
    mu = x.mean(-1, keepdims=True)
    var = ((x - mu) ** 2).mean(-1, keepdims=True)
    return (x - mu) / jnp.sqrt(var + eps) * g + b


def _block_forward(x, p):
    bsz, n, d = x.shape
    h = _layer_norm(x, p['ln1_g'], p['ln1_b'])
    qkv = lora_qkv(h.reshape(bsz * n, d), p['wqkv'], p['bqkv'],
                   p['aq'], p['bq'], p['av'], p['bv'])                 # (B*N, 3D) bf16
    qkv = qkv.reshape(bsz, n, 3, NUM_HEADS, d // NUM_HEADS).transpose(2, 0, 3, 1, 4)
    q, k, v = qkv[0], qkv[1], qkv[2]
    scale = (d // NUM_HEADS) ** -0.5
    # TODO(synk): at production N (~1370 tokens) this softmax-attention belongs in a
    # flash-attention Pallas kernel; at the toy N=17 it stays in XLA.
    scores = jnp.einsum('bhqd,bhkd->bhqk', q, k,
                        preferred_element_type=jnp.float32) * scale
    attn = jax.nn.softmax(scores, axis=-1)
    o = jnp.einsum('bhqk,bhkd->bhqd', attn.astype(v.dtype), v,
                   preferred_element_type=jnp.float32)
    o = o.transpose(0, 2, 1, 3).reshape(bsz * n, d)
    x = x + linear_pallas(o, p['wproj'], p['bproj'],
                          out_dtype=jnp.float32).reshape(bsz, n, d)
    h2 = _layer_norm(x, p['ln2_g'], p['ln2_b'])
    hid = linear_pallas(h2.reshape(bsz * n, d), p['w1'], p['b1'],
                        activation="gelu", out_dtype=jnp.bfloat16)     # fused bias+GELU
    mlp = linear_pallas(hid, p['w2'], p['b2'], out_dtype=jnp.float32)
    x = x + mlp.reshape(bsz, n, d)
    return x


def backbone_intermediate_layers(pixel_values, params):
    """Mimics dinov2.get_intermediate_layers(..., reshape=True, return_class_token=True)."""
    bsz, cin, hh, ww = pixel_values.shape
    h, w = hh // PATCH, ww // PATCH
    patches = pixel_values.reshape(bsz, cin, h, PATCH, w, PATCH)
    patches = patches.transpose(0, 2, 4, 1, 3, 5).reshape(bsz, h * w, cin * PATCH * PATCH)
    x = patches @ params['patch_w'] + params['patch_b']
    cls = jnp.broadcast_to(params['cls_token'], (bsz, 1, D))
    x = jnp.concatenate([cls, x], axis=1) + params['pos_embed']
    feats = []
    for p in params['blocks']:
        x = _block_forward(x, p)
        patch_tok = x[:, 1:, :].reshape(bsz, h, w, D).transpose(0, 3, 1, 2)   # (B, D, h, w)
        feats.append((patch_tok, x[:, 0, :]))                                 # (map, cls_token)
    return feats


# ================================ decode_head_linear ================================
def decode_head_forward(features, conv_w, conv_b):
    # Reference semantics: per layer concat([patch_map, broadcast(cls_token)], ch), bilinear
    # upsample each by UPSAMPLE, concat over layers, 1x1 conv -> relu+0.1 -> channel-normalize
    # -> bin-weighted sum, then resize to IMAGE_SHAPE.
    # Optimizations:
    #  * the broadcast cls channels are spatially constant (and stay constant under bilinear
    #    resize), so their 1x1-conv contribution collapses to a per-image (B, NB) bias — they
    #    never enter the Pallas slab, halving its HBM traffic;
    #  * each upsampled patch map is cast to bf16 *before* the concat so the (B, 4D, H, W)
    #    slab — the largest decode-path tensor — is written once at half width and consumed
    #    by the Pallas kernel without a second re-cast copy.
    nl = len(features)
    bsz, d = features[0][1].shape
    th = features[0][0].shape[2] * UPSAMPLE
    tw = features[0][0].shape[3] * UPSAMPLE

    patch_maps = [
        jax.image.resize(x, (x.shape[0], x.shape[1], th, tw), method='bilinear')
            .astype(jnp.bfloat16)                                 # align_corners=False
        for x, _ in features]
    feat_patch = jnp.concatenate(patch_maps, axis=1)              # (B, 4D, H, W) bf16
    cls_concat = jnp.concatenate([c for _, c in features], axis=-1)   # (B, 4D) f32

    # conv_depth weight rows follow the original channel order [x0, cls0, x1, cls1, ...].
    w4 = conv_w.reshape(nl, 2, d, N_BINS)
    w_patch = w4[:, 0].reshape(nl * d, N_BINS)                    # rows for patch-token channels
    w_cls = w4[:, 1].reshape(nl * d, N_BINS)                      # rows for cls-token channels
    cls_bias = cls_concat @ w_cls + conv_b.reshape(1, N_BINS)     # (B, NB) includes conv bias

    # TODO(synk): reference `_forward_feature` calls undefined `self.bn`; its result is discarded
    # (the method returns x), so it is skipped here.
    bins = jnp.linspace(MIN_DEPTH, MAX_DEPTH, N_BINS, dtype=jnp.float32)
    depth = depth_pred_pallas(feat_patch, w_patch, cls_bias, bins)     # (B, H, W)
    depth = depth[:, None, :, :]                                       # (B, 1, H, W)
    return jax.image.resize(depth, (bsz, 1, IMAGE_SHAPE[0], IMAGE_SHAPE[1]), method='bilinear')


# ================================== full model ==================================
def surgical_dino_forward(params, pixel_values):
    features = backbone_intermediate_layers(pixel_values, params)
    pred = decode_head_forward(features, params['conv_w'], params['conv_b'])
    # TODO(synk): SigLoss / GradientLoss branch only runs when depth_gt is given; the
    # default forward (depth_gt=None) returns loss=None, which is what we reproduce.
    return pred                                                                 # (B, 1, 56, 56)


# ================================== parameters ==================================
def init_params(key):
    def nrm(k, shape, scale=0.02):
        return scale * jax.random.normal(k, shape, dtype=jnp.float32)

    ks = jax.random.split(key, 8)
    blocks = []
    for kb in jax.random.split(ks[0], NUM_BLOCKS):
        kk = jax.random.split(kb, 8)
        blocks.append(dict(
            ln1_g=jnp.ones((D,), jnp.float32), ln1_b=jnp.zeros((D,), jnp.float32),
            wqkv=nrm(kk[0], (D, 3 * D)), bqkv=jnp.zeros((1, 3 * D), jnp.float32),
            aq=nrm(kk[1], (D, R), scale=0.1), bq=jnp.zeros((R, D), jnp.float32),   # zeros per reset_parameters
            av=nrm(kk[2], (D, R), scale=0.1), bv=jnp.zeros((R, D), jnp.float32),
            wproj=nrm(kk[3], (D, D)), bproj=jnp.zeros((D,), jnp.float32),
            ln2_g=jnp.ones((D,), jnp.float32), ln2_b=jnp.zeros((D,), jnp.float32),
            w1=nrm(kk[4], (D, 4 * D)), b1=jnp.zeros((4 * D,), jnp.float32),
            w2=nrm(kk[5], (4 * D, D)), b2=jnp.zeros((D,), jnp.float32),
        ))
    n_tokens = (IMAGE_SHAPE[0] // PATCH) * (IMAGE_SHAPE[1] // PATCH) + 1
    return dict(
        patch_w=nrm(ks[1], (3 * PATCH * PATCH, D)),
        patch_b=jnp.zeros((D,), jnp.float32),
        cls_token=nrm(ks[2], (1, 1, D)),
        pos_embed=nrm(ks[3], (1, n_tokens, D)),
        blocks=blocks,
        conv_w=nrm(ks[4], (CHANNELS, N_BINS)),        # = conv_depth.weight (n_bins, C, 1, 1) transposed
        conv_b=jnp.zeros((1, N_BINS), jnp.float32),   # = conv_depth.bias
    )


if __name__ == "__main__":
    key = jax.random.PRNGKey(0)
    pkey, xkey = jax.random.split(key)
    params = init_params(pkey)
    pixel_values = jax.random.normal(xkey, (2, 3, IMAGE_SHAPE[0], IMAGE_SHAPE[1]), dtype=jnp.float32)

    pred = jax.jit(surgical_dino_forward)(params, pixel_values)
    jax.block_until_ready(pred)
    assert pred.shape == (2, 1, IMAGE_SHAPE[0], IMAGE_SHAPE[1]), pred.shape
    assert bool(jnp.all(jnp.isfinite(pred)))
    print("KERNEL_OK")
</pallas_src>

<mosaic_0001>
module attributes {stable_mosaic.version = 11 : i64} {
  func.func @_linear_kernel(%arg0: i32, %arg1: memref<256x32xbf16, #tpu.memory_space<vmem>>, %arg2: memref<32x96xbf16, #tpu.memory_space<vmem>>, %arg3: memref<1x96xf32, #tpu.memory_space<vmem>>, %arg4: memref<256x96xbf16, #tpu.memory_space<vmem>>) attributes {dimension_semantics = [#tpu.dimension_semantics<parallel>], iteration_bounds = array<i64: 1>, scalar_prefetch = 0 : i64, scratch_operands = 0 : i64, tpu.core_type = #tpu.core_type<tc>, window_params = [{transform_indices = @transform_0, window_bounds = array<i64: 256, 32>}, {pipeline_mode = #tpu.pipeline_mode<synchronous>, transform_indices = @transform_1, window_bounds = array<i64: 32, 96>}, {pipeline_mode = #tpu.pipeline_mode<synchronous>, transform_indices = @transform_2, window_bounds = array<i64: 1, 96>}, {transform_indices = @transform_3, window_bounds = array<i64: 256, 96>}]} {
    %c0 = arith.constant 0 : index
    %c0_0 = arith.constant 0 : index
    %0 = vector.load %arg1[%c0, %c0_0] : memref<256x32xbf16, #tpu.memory_space<vmem>>, vector<256x32xbf16>
    %c0_1 = arith.constant 0 : index
    %c0_2 = arith.constant 0 : index
    %1 = vector.load %arg2[%c0_1, %c0_2] : memref<32x96xbf16, #tpu.memory_space<vmem>>, vector<32x96xbf16>
    %cst = arith.constant dense<0.000000e+00> : vector<256x96xf32>
    %2 = tpu.matmul %0, %1, %cst {dimension_numbers = #tpu.dot_dimension_numbers<[1], [0], [0], [1], [0, 0, 1, 1], [], []>} : vector<256x32xbf16>, vector<32x96xbf16>, vector<256x96xf32> -> vector<256x96xf32>
    %c0_3 = arith.constant 0 : index
    %c0_4 = arith.constant 0 : index
    %3 = vector.load %arg3[%c0_3, %c0_4] : memref<1x96xf32, #tpu.memory_space<vmem>>, vector<1x96xf32>
    %4 = vector.broadcast %3 : vector<1x96xf32> to vector<256x96xf32>
    %5 = arith.addf %2, %4 : vector<256x96xf32>
    %6 = arith.truncf %5 : vector<256x96xf32> to vector<256x96xbf16>
    %c0_5 = arith.constant 0 : index
    %c0_6 = arith.constant 0 : index
    %7 = vector.load %arg4[%c0_5, %c0_6] : memref<256x96xbf16, #tpu.memory_space<vmem>>, vector<256x96xbf16>
    tpu.vector_store %arg4[%c0_5, %c0_6], %6 {strides = array<i32>} : memref<256x96xbf16, #tpu.memory_space<vmem>>, vector<256x96xbf16>,
    return
  }
  func.func @transform_0(%arg0: i32) -> (i32, i32) {
    %c0_i32 = arith.constant 0 : i32
    %c0_i32_0 = arith.constant 0 : i32
    return %arg0, %c0_i32 : i32, i32
  }
  func.func @transform_1(%arg0: i32) -> (i32, i32) {
    %c0_i32 = arith.constant 0 : i32
    %c0_i32_0 = arith.constant 0 : i32
    %c0_i32_1 = arith.constant 0 : i32
    return %c0_i32, %c0_i32_0 : i32, i32
  }
  func.func @transform_2(%arg0: i32) -> (i32, i32) {
    %c0_i32 = arith.constant 0 : i32
    %c0_i32_0 = arith.constant 0 : i32
    %c0_i32_1 = arith.constant 0 : i32
    return %c0_i32, %c0_i32_0 : i32, i32
  }
  func.func @transform_3(%arg0: i32) -> (i32, i32) {
    %c0_i32 = arith.constant 0 : i32
    %c0_i32_0 = arith.constant 0 : i32
    return %arg0, %c0_i32 : i32, i32
  }
}

module attributes {stable_mosaic.version = 11 : i64} {
  func.func @_linear_kernel(%arg0: i32, %arg1: memref<256x32xbf16, #tpu.memory_space<vmem>>, %arg2: memref<32x128xbf16, #tpu.memory_space<vmem>>, %arg3: memref<1x128xf32, #tpu.memory_space<vmem>>, %arg4: memref<256x128xbf16, #tpu.memory_space<vmem>>) attributes {dimension_semantics = [#tpu.dimension_semantics<parallel>], iteration_bounds = array<i64: 1>, scalar_prefetch = 0 : i64, scratch_operands = 0 : i64, tpu.core_type = #tpu.core_type<tc>, window_params = [{transform_indices = @transform_0, window_bounds = array<i64: 256, 32>}, {pipeline_mode = #tpu.pipeline_mode<synchronous>, transform_indices = @transform_1, window_bounds = array<i64: 32, 128>}, {pipeline_mode = #tpu.pipeline_mode<synchronous>, transform_indices = @transform_2, window_bounds = array<i64: 1, 128>}, {transform_indices = @transform_3, window_bounds = array<i64: 256, 128>}]} {
    %c0 = arith.constant 0 : index
    %c0_0 = arith.constant 0 : index
    %0 = vector.load %arg1[%c0, %c0_0] : memref<256x32xbf16, #tpu.memory_space<vmem>>, vector<256x32xbf16>
    %c0_1 = arith.constant 0 : index
    %c0_2 = arith.constant 0 : index
    %1 = vector.load %arg2[%c0_1, %c0_2] : memref<32x128xbf16, #tpu.memory_space<vmem>>, vector<32x128xbf16>
    %cst = arith.constant dense<0.000000e+00> : vector<256x128xf32>
    %2 = tpu.matmul %0, %1, %cst {dimension_numbers = #tpu.dot_dimension_numbers<[1], [0], [0], [1], [0, 0, 1, 1], [], []>} : vector<256x32xbf16>, vector<32x128xbf16>, vector<256x128xf32> -> vector<256x128xf32>
    %c0_3 = arith.constant 0 : index
    %c0_4 = arith.constant 0 : index
    %3 = vector.load %arg3[%c0_3, %c0_4] : memref<1x128xf32, #tpu.memory_space<vmem>>, vector<1x128xf32>
    %4 = vector.broadcast %3 : vector<1x128xf32> to vector<256x128xf32>
    %5 = arith.addf %2, %4 : vector<256x128xf32>
    %6 = arith.mulf %5, %5 : vector<256x128xf32>
    %7 = arith.mulf %5, %6 : vector<256x128xf32>
    %cst_5 = arith.constant 4.471500e-02 : f32
    %8 = vector.broadcast %cst_5 : f32 to vector<256x128xf32>
    %9 = arith.mulf %8, %7 : vector<256x128xf32>
    %10 = arith.addf %5, %9 : vector<256x128xf32>
    %cst_6 = arith.constant 0.797884583 : f32
    %11 = vector.broadcast %cst_6 : f32 to vector<256x128xf32>
    %12 = arith.mulf %11, %10 : vector<256x128xf32>
    %13 = math.tanh %12 : vector<256x128xf32>
    %cst_7 = arith.constant 1.000000e+00 : f32
    %14 = vector.broadcast %cst_7 : f32 to vector<256x128xf32>
    %15 = arith.addf %14, %13 : vector<256x128xf32>
    %cst_8 = arith.constant 5.000000e-01 : f32
    %16 = vector.broadcast %cst_8 : f32 to vector<256x128xf32>
    %17 = arith.mulf %16, %15 : vector<256x128xf32>
    %18 = arith.mulf %5, %17 : vector<256x128xf32>
    %19 = arith.truncf %18 : vector<256x128xf32> to vector<256x128xbf16>
    %c0_9 = arith.constant 0 : index
    %c0_10 = arith.constant 0 : index
    %20 = vector.load %arg4[%c0_9, %c0_10] : memref<256x128xbf16, #tpu.memory_space<vmem>>, vector<256x128xbf16>
    tpu.vector_store %arg4[%c0_9, %c0_10], %19 {strides = array<i32>} : memref<256x128xbf16, #tpu.memory_space<vmem>>, vector<256x128xbf16>,
    return
  }
  func.func @transform_0(%arg0: i32) -> (i32, i32) {
    %c0_i32 = arith.constant 0 : i32
    %c0_i32_0 = arith.constant 0 : i32
    return %arg0, %c0_i32 : i32, i32
  }
  func.func @transform_1(%arg0: i32) -> (i32, i32) {
    %c0_i32 = arith.constant 0 : i32
    %c0_i32_0 = arith.constant 0 : i32
    %c0_i32_1 = arith.constant 0 : i32
    return %c0_i32, %c0_i32_0 : i32, i32
  }
  func.func @transform_2(%arg0: i32) -> (i32, i32) {
    %c0_i32 = arith.constant 0 : i32
    %c0_i32_0 = arith.constant 0 : i32
    %c0_i32_1 = arith.constant 0 : i32
    return %c0_i32, %c0_i32_0 : i32, i32
  }
  func.func @transform_3(%arg0: i32) -> (i32, i32) {
    %c0_i32 = arith.constant 0 : i32
    %c0_i32_0 = arith.constant 0 : i32
    return %arg0, %c0_i32 : i32, i32
  }
}

module attributes {stable_mosaic.version = 11 : i64} {
  func.func @_linear_kernel(%arg0: i32, %arg1: memref<256x32xbf16, #tpu.memory_space<vmem>>, %arg2: memref<32x32xbf16, #tpu.memory_space<vmem>>, %arg3: memref<1x32xf32, #tpu.memory_space<vmem>>, %arg4: memref<256x32xf32, #tpu.memory_space<vmem>>) attributes {dimension_semantics = [#tpu.dimension_semantics<parallel>], iteration_bounds = array<i64: 1>, scalar_prefetch = 0 : i64, scratch_operands = 0 : i64, tpu.core_type = #tpu.core_type<tc>, window_params = [{transform_indices = @transform_0, window_bounds = array<i64: 256, 32>}, {pipeline_mode = #tpu.pipeline_mode<synchronous>, transform_indices = @transform_1, window_bounds = array<i64: 32, 32>}, {pipeline_mode = #tpu.pipeline_mode<synchronous>, transform_indices = @transform_2, window_bounds = array<i64: 1, 32>}, {transform_indices = @transform_3, window_bounds = array<i64: 256, 32>}]} {
    %c0 = arith.constant 0 : index
    %c0_0 = arith.constant 0 : index
    %0 = vector.load %arg1[%c0, %c0_0] : memref<256x32xbf16, #tpu.memory_space<vmem>>, vector<256x32xbf16>
    %c0_1 = arith.constant 0 : index
    %c0_2 = arith.constant 0 : index
    %1 = vector.load %arg2[%c0_1, %c0_2] : memref<32x32xbf16, #tpu.memory_space<vmem>>, vector<32x32xbf16>
    %cst = arith.constant dense<0.000000e+00> : vector<256x32xf32>
    %2 = tpu.matmul %0, %1, %cst {dimension_numbers = #tpu.dot_dimension_numbers<[1], [0], [0], [1], [0, 0, 1, 1], [], []>} : vector<256x32xbf16>, vector<32x32xbf16>, vector<256x32xf32> -> vector<256x32xf32>
    %c0_3 = arith.constant 0 : index
    %c0_4 = arith.constant 0 : index
    %3 = vector.load %arg3[%c0_3, %c0_4] : memref<1x32xf32, #tpu.memory_space<vmem>>, vector<1x32xf32>
    %4 = vector.broadcast %3 : vector<1x32xf32> to vector<256x32xf32>
    %5 = arith.addf %2, %4 : vector<256x32xf32>
    %c0_5 = arith.constant 0 : index
    %c0_6 = arith.constant 0 : index
    %6 = vector.load %arg4[%c0_5, %c0_6] : memref<256x32xf32, #tpu.memory_space<vmem>>, vector<256x32xf32>
    tpu.vector_store %arg4[%c0_5, %c0_6], %5 {strides = array<i32>} : memref<256x32xf32, #tpu.memory_space<vmem>>, vector<256x32xf32>,
    return
  }
  func.func @transform_0(%arg0: i32) -> (i32, i32) {
    %c0_i32 = arith.constant 0 : i32
    %c0_i32_0 = arith.constant 0 : i32
    return %arg0, %c0_i32 : i32, i32
  }
  func.func @transform_1(%arg0: i32) -> (i32, i32) {
    %c0_i32 = arith.constant 0 : i32
    %c0_i32_0 = arith.constant 0 : i32
    %c0_i32_1 = arith.constant 0 : i32
    return %c0_i32, %c0_i32_0 : i32, i32
  }
  func.func @transform_2(%arg0: i32) -> (i32, i32) {
    %c0_i32 = arith.constant 0 : i32
    %c0_i32_0 = arith.constant 0 : i32
    %c0_i32_1 = arith.constant 0 : i32
    return %c0_i32, %c0_i32_0 : i32, i32
  }
  func.func @transform_3(%arg0: i32) -> (i32, i32) {
    %c0_i32 = arith.constant 0 : i32
    %c0_i32_0 = arith.constant 0 : i32
    return %arg0, %c0_i32 : i32, i32
  }
}

module attributes {stable_mosaic.version = 11 : i64} {
  func.func @_linear_kernel(%arg0: i32, %arg1: memref<256x128xbf16, #tpu.memory_space<vmem>>, %arg2: memref<128x32xbf16, #tpu.memory_space<vmem>>, %arg3: memref<1x32xf32, #tpu.memory_space<vmem>>, %arg4: memref<256x32xf32, #tpu.memory_space<vmem>>) attributes {dimension_semantics = [#tpu.dimension_semantics<parallel>], iteration_bounds = array<i64: 1>, scalar_prefetch = 0 : i64, scratch_operands = 0 : i64, tpu.core_type = #tpu.core_type<tc>, window_params = [{transform_indices = @transform_0, window_bounds = array<i64: 256, 128>}, {pipeline_mode = #tpu.pipeline_mode<synchronous>, transform_indices = @transform_1, window_bounds = array<i64: 128, 32>}, {pipeline_mode = #tpu.pipeline_mode<synchronous>, transform_indices = @transform_2, window_bounds = array<i64: 1, 32>}, {transform_indices = @transform_3, window_bounds = array<i64: 256, 32>}]} {
    %c0 = arith.constant 0 : index
    %c0_0 = arith.constant 0 : index
    %0 = vector.load %arg1[%c0, %c0_0] : memref<256x128xbf16, #tpu.memory_space<vmem>>, vector<256x128xbf16>
    %c0_1 = arith.constant 0 : index
    %c0_2 = arith.constant 0 : index
    %1 = vector.load %arg2[%c0_1, %c0_2] : memref<128x32xbf16, #tpu.memory_space<vmem>>, vector<128x32xbf16>
    %cst = arith.constant dense<0.000000e+00> : vector<256x32xf32>
    %2 = tpu.matmul %0, %1, %cst {dimension_numbers = #tpu.dot_dimension_numbers<[1], [0], [0], [1], [0, 0, 1, 1], [], []>} : vector<256x128xbf16>, vector<128x32xbf16>, vector<256x32xf32> -> vector<256x32xf32>
    %c0_3 = arith.constant 0 : index
    %c0_4 = arith.constant 0 : index
    %3 = vector.load %arg3[%c0_3, %c0_4] : memref<1x32xf32, #tpu.memory_space<vmem>>, vector<1x32xf32>
    %4 = vector.broadcast %3 : vector<1x32xf32> to vector<256x32xf32>
    %5 = arith.addf %2, %4 : vector<256x32xf32>
    %c0_5 = arith.constant 0 : index
    %c0_6 = arith.constant 0 : index
    %6 = vector.load %arg4[%c0_5, %c0_6] : memref<256x32xf32, #tpu.memory_space<vmem>>, vector<256x32xf32>
    tpu.vector_store %arg4[%c0_5, %c0_6], %5 {strides = array<i32>} : memref<256x32xf32, #tpu.memory_space<vmem>>, vector<256x32xf32>,
    return
  }
  func.func @transform_0(%arg0: i32) -> (i32, i32) {
    %c0_i32 = arith.constant 0 : i32
    %c0_i32_0 = arith.constant 0 : i32
    return %arg0, %c0_i32 : i32, i32
  }
  func.func @transform_1(%arg0: i32) -> (i32, i32) {
    %c0_i32 = arith.constant 0 : i32
    %c0_i32_0 = arith.constant 0 : i32
    %c0_i32_1 = arith.constant 0 : i32
    return %c0_i32, %c0_i32_0 : i32, i32
  }
  func.func @transform_2(%arg0: i32) -> (i32, i32) {
    %c0_i32 = arith.constant 0 : i32
    %c0_i32_0 = arith.constant 0 : i32
    %c0_i32_1 = arith.constant 0 : i32
    return %c0_i32, %c0_i32_0 : i32, i32
  }
  func.func @transform_3(%arg0: i32) -> (i32, i32) {
    %c0_i32 = arith.constant 0 : i32
    %c0_i32_0 = arith.constant 0 : i32
    return %arg0, %c0_i32 : i32, i32
  }
}

module attributes {stable_mosaic.version = 11 : i64} {
  func.func @_depth_pred_kernel(%arg0: i32, %arg1: i32, %arg2: memref<1x128x256xbf16, #tpu.memory_space<vmem>>, %arg3: memref<16x128xbf16, #tpu.memory_space<vmem>>, %arg4: memref<1x16x1xf32, #tpu.memory_space<vmem>>, %arg5: memref<16x1xf32, #tpu.memory_space<vmem>>, %arg6: memref<1x1x256xf32, #tpu.memory_space<vmem>>) attributes {dimension_semantics = [#tpu.dimension_semantics<parallel>, #tpu.dimension_semantics<parallel>], iteration_bounds = array<i64: 2, 1>, scalar_prefetch = 0 : i64, scratch_operands = 0 : i64, tpu.core_type = #tpu.core_type<tc>, window_params = [{pipeline_mode = #tpu.pipeline_mode<double_buffered>, transform_indices = @transform_0, window_bounds = array<i64: 1, 128, 256>}, {pipeline_mode = #tpu.pipeline_mode<synchronous>, transform_indices = @transform_1, window_bounds = array<i64: 16, 128>}, {transform_indices = @transform_2, window_bounds = array<i64: 1, 16, 1>}, {pipeline_mode = #tpu.pipeline_mode<synchronous>, transform_indices = @transform_3, window_bounds = array<i64: 16, 1>}, {transform_indices = @transform_4, window_bounds = array<i64: 1, 1, 256>}]} {
    %c0 = arith.constant 0 : index
    %c0_0 = arith.constant 0 : index
    %0 = vector.load %arg3[%c0, %c0_0] : memref<16x128xbf16, #tpu.memory_space<vmem>>, vector<16x128xbf16>
    %c0_1 = arith.constant 0 : index
    %c0_2 = arith.constant 0 : index
    %c0_3 = arith.constant 0 : index
    %1 = vector.load %arg2[%c0_1, %c0_2, %c0_3] : memref<1x128x256xbf16, #tpu.memory_space<vmem>>, vector<1x128x256xbf16>
    %2 = vector.shape_cast %1 : vector<1x128x256xbf16> to vector<128x256xbf16>
    %cst = arith.constant dense<0.000000e+00> : vector<16x256xf32>
    %3 = tpu.matmul %0, %2, %cst {dimension_numbers = #tpu.dot_dimension_numbers<[1], [0], [0], [1], [0, 0, 1, 1], [], []>} : vector<16x128xbf16>, vector<128x256xbf16>, vector<16x256xf32> -> vector<16x256xf32>
    %c0_4 = arith.constant 0 : index
    %c0_5 = arith.constant 0 : index
    %c0_6 = arith.constant 0 : index
    %4 = vector.load %arg4[%c0_4, %c0_5, %c0_6] : memref<1x16x1xf32, #tpu.memory_space<vmem>>, vector<1x16x1xf32>
    %5 = vector.shape_cast %4 : vector<1x16x1xf32> to vector<16x1xf32>
    %6 = vector.broadcast %5 : vector<16x1xf32> to vector<16x256xf32>
    %7 = arith.addf %3, %6 : vector<16x256xf32>
    %cst_7 = arith.constant 0.000000e+00 : f32
    %8 = vector.broadcast %cst_7 : f32 to vector<16x256xf32>
    %9 = arith.maximumf %7, %8 : vector<16x256xf32>
    %cst_8 = arith.constant 1.000000e-01 : f32
    %10 = vector.broadcast %cst_8 : f32 to vector<16x256xf32>
    %11 = arith.addf %9, %10 : vector<16x256xf32>
    %cst_9 = arith.constant dense<0.000000e+00> : vector<256xf32>
    %12 = vector.multi_reduction <add>, %11, %cst_9 [0] : vector<16x256xf32> to vector<256xf32>
    %13 = vector.shape_cast %12 : vector<256xf32> to vector<1x256xf32>
    %c0_10 = arith.constant 0 : index
    %c0_11 = arith.constant 0 : index
    %14 = vector.load %arg5[%c0_10, %c0_11] : memref<16x1xf32, #tpu.memory_space<vmem>>, vector<16x1xf32>
    %15 = vector.broadcast %14 : vector<16x1xf32> to vector<16x256xf32>
    %16 = arith.mulf %11, %15 : vector<16x256xf32>
    %cst_12 = arith.constant dense<0.000000e+00> : vector<256xf32>
    %17 = vector.multi_reduction <add>, %16, %cst_12 [0] : vector<16x256xf32> to vector<256xf32>
    %18 = vector.shape_cast %17 : vector<256xf32> to vector<1x256xf32>
    %19 = arith.divf %18, %13 : vector<1x256xf32>
    %c0_13 = arith.constant 0 : index
    %c0_14 = arith.constant 0 : index
    %c0_15 = arith.constant 0 : index
    %20 = vector.load %arg6[%c0_13, %c0_14, %c0_15] : memref<1x1x256xf32, #tpu.memory_space<vmem>>, vector<1x1x256xf32>
    %21 = vector.shape_cast %20 : vector<1x1x256xf32> to vector<1x256xf32>
    %22 = vector.shape_cast %19 : vector<1x256xf32> to vector<1x1x256xf32>
    tpu.vector_store %arg6[%c0_13, %c0_14, %c0_15], %22 {strides = array<i32>} : memref<1x1x256xf32, #tpu.memory_space<vmem>>, vector<1x1x256xf32>,
    return
  }
  func.func @transform_0(%arg0: i32, %arg1: i32) -> (i32, i32, i32) {
    %c0_i32 = arith.constant 0 : i32
    %c0_i32_0 = arith.constant 0 : i32
    return %arg0, %c0_i32, %arg1 : i32, i32, i32
  }
  func.func @transform_1(%arg0: i32, %arg1: i32) -> (i32, i32) {
    %c0_i32 = arith.constant 0 : i32
    %c0_i32_0 = arith.constant 0 : i32
    %c0_i32_1 = arith.constant 0 : i32
    return %c0_i32, %c0_i32_0 : i32, i32
  }
  func.func @transform_2(%arg0: i32, %arg1: i32) -> (i32, i32, i32) {
    %c0_i32 = arith.constant 0 : i32
    %c0_i32_0 = arith.constant 0 : i32
    %c0_i32_1 = arith.constant 0 : i32
    return %arg0, %c0_i32, %c0_i32_0 : i32, i32, i32
  }
  func.func @transform_3(%arg0: i32, %arg1: i32) -> (i32, i32) {
    %c0_i32 = arith.constant 0 : i32
    %c0_i32_0 = arith.constant 0 : i32
    %c0_i32_1 = arith.constant 0 : i32
    return %c0_i32, %c0_i32_0 : i32, i32
  }
  func.func @transform_4(%arg0: i32, %arg1: i32) -> (i32, i32, i32) {
    %c1_i32 = arith.constant 1 : i32
    %0 = arith.muli %arg0, %c1_i32 : i32
    %1 = arith.addi %0, %arg1 : i32
    %c0_i32 = arith.constant 0 : i32
    %c0_i32_0 = arith.constant 0 : i32
    %c0_i32_1 = arith.constant 0 : i32
    return %1, %c0_i32, %c0_i32_0 : i32, i32, i32
  }
}

</mosaic_0001>

<bundles_post_ra>
// kernel: surgical_dino_forward.17
= control target key start
LH: loop header
LB: loop body
LE: loop exit
PB: predicated region body
PF: predicated region fallthrough
CT: control target
= control target key end

     0   :  { %vm150_vm0 = vcmask 261120   ;;  %vm488_vm1 = vcmask 781312   ;;  %s955_s1 = inlined_call_operand.vmem [shape: bf16[32,96], index: 1, kind: input, shape index: {}]   ;;  %s956_s0 = inlined_call_operand.vmem [shape: bf16[256,32], index: 0, kind: input, shape index: {}]   ;;  %s957_s2 = inlined_call_operand.vmem [shape: f32[1,96], index: 2, kind: input, shape index: {}]   ;;  %s958_s3 = inlined_call_operand.vmem [shape: bf16[256,96], index: 3, kind: output, shape index: {}]  }
   0x1   :  { %v682_v0 = vld [vmem:[%s955_s1] sm:$0xff]   ;;  %v683_v1 = vld [vmem:[%s955_s1 + $0x8] sm:$0xff]   ;;  %v688_v6 = vld [vmem:[%s956_s0 + $0x10] sm:$0xff]  }
   0x2   :  { %642 = vmatprep.subr.bf16.mxu0 %v682_v0  ;;  %678 = vmatprep.subr.bf16.mxu1 %v682_v0  ;;  %v684_v2 = vld [vmem:[%s956_s0] sm:$0xff]   ;;  %v686_v4 = vld [vmem:[%s956_s0 + $0x8] sm:$0xff]   ;;  %v689_v7 = vld [vmem:[%s956_s0 + $0x50] sm:$0xff]  }
   0x3   :  { %643 = vmatpush3.bf16.msra.mxu0 %v682_v0  ;;  %680 = vmatpush3.bf16.msra.mxu1 %v682_v0  ;;  %v685_v3 = vld [vmem:[%s956_s0 + $0x40] sm:$0xff]   ;;  %v687_v5 = vld [vmem:[%s956_s0 + $0x48] sm:$0xff]   ;;  %v690_v8 = vld [vmem:[%s956_s0 + $0x18] sm:$0xff]  }
   0x4   :  { %644 = vmatprep.subr.bf16.mxu0 %v683_v1  ;;  %679 = vmatprep.subr.bf16.mxu1 %v683_v1  ;;  %v691_v9 = vld [vmem:[%s956_s0 + $0x58] sm:$0xff]   ;;  %v692_v10 = vld [vmem:[%s956_s0 + $0x20] sm:$0xff]   ;;  %v694_v12 = vld [vmem:[%s956_s0 + $0x28] sm:$0xff]  }
   0x5   :  { %646 = vmatprep.mubr.msk.bf16.mxu0 %vm150_vm0, %v684_v2  ;;  %662 = vmatprep.mubr.msk.bf16.mxu1 %vm150_vm0, %v685_v3  ;;  %v693_v11 = vld [vmem:[%s956_s0 + $0x60] sm:$0xff]   ;;  %v695_v13 = vld [vmem:[%s956_s0 + $0x68] sm:$0xff]   ;;  %v696_v14 = vld [vmem:[%s956_s0 + $0x30] sm:$0xff]  }
   0x6   :  { %v697_v15 = vld [vmem:[%s956_s0 + $0x70] sm:$0xff]   ;;  %v698_v16 = vld [vmem:[%s956_s0 + $0x38] sm:$0xff]   ;;  %v793_v18 = vld [vmem:[%s957_s2] ss:$0 sm:$0xff] }
   0x7   :  { %645 = vmatpush3.bf16.msra.mxu0 %v683_v1  ;;  %681 = vmatpush3.bf16.msra.mxu1 %v683_v1  ;;  %v699_v17 = vld [vmem:[%s956_s0 + $0x78] sm:$0xff]  }
   0xa   :  { %647 = vmatmul.mubr.msk.bf16.vlgmr.msra.gmra.mrb[0].mxu0 %vm150_vm0, %v686_v4  ;;  %663 = vmatmul.mubr.msk.bf16.vlgmr.msra.gmra.mrb[0].mxu1 %vm150_vm0, %v687_v5 }
   0xb   :  { %650 = vmatprep.mubr.msk.bf16.mxu0 %vm150_vm0, %v688_v6  ;;  %666 = vmatprep.mubr.msk.bf16.mxu1 %vm150_vm0, %v689_v7 }
  0x12   :  { %651 = vmatmul.mubr.msk.bf16.gmra.mrb[4].mxu0 %vm150_vm0, %v690_v8  ;;  %667 = vmatmul.mubr.msk.bf16.gmra.mrb[4].mxu1 %vm150_vm0, %v691_v9 }
  0x13   :  { %654 = vmatprep.mubr.msk.bf16.mxu0 %vm150_vm0, %v692_v10  ;;  %670 = vmatprep.mubr.msk.bf16.mxu1 %vm150_vm0, %v693_v11 }
  0x1a   :  { %655 = vmatmul.mubr.msk.bf16.gmra.mrb[8].mxu0 %vm150_vm0, %v694_v12  ;;  %671 = vmatmul.mubr.msk.bf16.gmra.mrb[8].mxu1 %vm150_vm0, %v695_v13 }
  0x1b   :  { %658 = vmatprep.mubr.msk.bf16.mxu0 %vm150_vm0, %v696_v14  ;;  %674 = vmatprep.mubr.msk.bf16.mxu1 %vm150_vm0, %v697_v15 }
  0x22   :  { %659 = vmatmul.mubr.msk.bf16.gmra.mrb[12].mxu0 %vm150_vm0, %v698_v16  ;;  %675 = vmatmul.mubr.msk.bf16.gmra.mrb[12].mxu1 %vm150_vm0, %v699_v17 }
  0xdd   :  { %v648_v19 = vpop.f32.mrb[0].mxu0  ;;  %v664_v20 = vpop.f32.mrb[0].mxu1 }
  0xde   :  { %v242_v21 = vadd.f32 %v648_v19, %v793_v18  ;;  %v306_v22 = vadd.f32 %v664_v20, %v793_v18  ;;  %v233_v23 = vpop.f32.mrb[1].mxu0  ;;  %v297_v24 = vpop.f32.mrb[1].mxu1 }
  0xdf   :  { %v234_v25 = vadd.f32 %v793_v18, %v233_v23  ;;  %v298_v26 = vadd.f32 %v793_v18, %v297_v24  ;;  %v649_v27 = vpop.f32.mrb[2].mxu0  ;;  %v665_v28 = vpop.f32.mrb[2].mxu1 }
  0xe0   :  { %v594_v29 = vpack.c.bf16 %v242_v21, %v242_v21  ;;  %v610_v30 = vpack.c.bf16 %v306_v22, %v306_v22  ;;  %v245_v31 = vadd.f32 %v649_v27, %v793_v18  ;;  %v309_v32 = vadd.f32 %v665_v28, %v793_v18  ;;  %v236_v33 = vpop.f32.mrb[3].mxu0  ;;  %v300_v34 = vpop.f32.mrb[3].mxu1 }
  0xe1   :  { %v592_v35 = vpack.c.bf16 %v234_v25, %v234_v25  ;;  %v608_v36 = vpack.c.bf16 %v298_v26, %v298_v26  ;;  %v237_v37 = vadd.f32 %v793_v18, %v236_v33  ;;  %v301_v38 = vadd.f32 %v793_v18, %v300_v34 }
  0xe2   :  { %491 = vst.msk [vmem:[%s958_s3 + $0x8] sm:$0xf] %vm488_vm1, %v594_v29  ;;  %507 = vst.msk [vmem:[%s958_s3 + $0x48] sm:$0xf] %vm488_vm1, %v610_v30  ;;  %v595_v39 = vpack.c.bf16 %v245_v31, %v245_v31  ;;  %v611_v40 = vpack.c.bf16 %v309_v32, %v309_v32 }
  0xe3   :  { %489 = vst.msk [vmem:[%s958_s3] sm:$0xf] %vm488_vm1, %v592_v35  ;;  %505 = vst.msk [vmem:[%s958_s3 + $0x40] sm:$0xf] %vm488_vm1, %v608_v36  ;;  %v593_v41 = vpack.c.bf16 %v237_v37, %v237_v37  ;;  %v609_v42 = vpack.c.bf16 %v301_v38, %v301_v38 }
  0xe4   :  { %492 = vst.msk [vmem:[%s958_s3 + $0xc] sm:$0xf] %vm488_vm1, %v595_v39  ;;  %508 = vst.msk [vmem:[%s958_s3 + $0x4c] sm:$0xf] %vm488_vm1, %v611_v40 }
  0xe5   :  { %490 = vst.msk [vmem:[%s958_s3 + $0x4] sm:$0xf] %vm488_vm1, %v593_v41  ;;  %506 = vst.msk [vmem:[%s958_s3 + $0x44] sm:$0xf] %vm488_vm1, %v609_v42  ;;  %v652_v43 = vpop.f32.mrb[4].mxu0  ;;  %v668_v44 = vpop.f32.mrb[4].mxu1 }
  0xe6   :  { %v258_v45 = vadd.f32 %v652_v43, %v793_v18  ;;  %v322_v46 = vadd.f32 %v668_v44, %v793_v18  ;;  %v249_v47 = vpop.f32.mrb[5].mxu0  ;;  %v313_v48 = vpop.f32.mrb[5].mxu1 }
  0xe7   :  { %v250_v49 = vadd.f32 %v793_v18, %v249_v47  ;;  %v314_v50 = vadd.f32 %v793_v18, %v313_v48  ;;  %v653_v51 = vpop.f32.mrb[6].mxu0  ;;  %v669_v52 = vpop.f32.mrb[6].mxu1 }
  0xe8   :  { %v598_v53 = vpack.c.bf16 %v258_v45, %v258_v45  ;;  %v614_v54 = vpack.c.bf16 %v322_v46, %v322_v46  ;;  %v261_v55 = vadd.f32 %v653_v51, %v793_v18  ;;  %v325_v56 = vadd.f32 %v669_v52, %v793_v18  ;;  %v252_v57 = vpop.f32.mrb[7].mxu0  ;;  %v316_v58 = vpop.f32.mrb[7].mxu1 }
  0xe9   :  { %v596_v59 = vpack.c.bf16 %v250_v49, %v250_v49  ;;  %v612_v60 = vpack.c.bf16 %v314_v50, %v314_v50  ;;  %v253_v61 = vadd.f32 %v793_v18, %v252_v57  ;;  %v317_v62 = vadd.f32 %v793_v18, %v316_v58 }
  0xea   :  { %495 = vst.msk [vmem:[%s958_s3 + $0x18] sm:$0xf] %vm488_vm1, %v598_v53  ;;  %511 = vst.msk [vmem:[%s958_s3 + $0x58] sm:$0xf] %vm488_vm1, %v614_v54  ;;  %v599_v63 = vpack.c.bf16 %v261_v55, %v261_v55  ;;  %v615_v0 = vpack.c.bf16 %v325_v56, %v325_v56 }
  0xeb   :  { %493 = vst.msk [vmem:[%s958_s3 + $0x10] sm:$0xf] %vm488_vm1, %v596_v59  ;;  %509 = vst.msk [vmem:[%s958_s3 + $0x50] sm:$0xf] %vm488_vm1, %v612_v60  ;;  %v597_v1 = vpack.c.bf16 %v253_v61, %v253_v61  ;;  %v613_v2 = vpack.c.bf16 %v317_v62, %v317_v62 }
  0xec   :  { %496 = vst.msk [vmem:[%s958_s3 + $0x1c] sm:$0xf] %vm488_vm1, %v599_v63  ;;  %512 = vst.msk [vmem:[%s958_s3 + $0x5c] sm:$0xf] %vm488_vm1, %v615_v0 }
  0xed   :  { %494 = vst.msk [vmem:[%s958_s3 + $0x14] sm:$0xf] %vm488_vm1, %v597_v1  ;;  %510 = vst.msk [vmem:[%s958_s3 + $0x54] sm:$0xf] %vm488_vm1, %v613_v2  ;;  %v656_v3 = vpop.f32.mrb[8].mxu0  ;;  %v672_v4 = vpop.f32.mrb[8].mxu1 }
  0xee   :  { %v274_v5 = vadd.f32 %v656_v3, %v793_v18  ;;  %v338_v6 = vadd.f32 %v672_v4, %v793_v18  ;;  %v265_v7 = vpop.f32.mrb[9].mxu0  ;;  %v329_v8 = vpop.f32.mrb[9].mxu1 }
  0xef   :  { %v266_v9 = vadd.f32 %v793_v18, %v265_v7  ;;  %v330_v10 = vadd.f32 %v793_v18, %v329_v8  ;;  %v657_v11 = vpop.f32.mrb[10].mxu0  ;;  %v673_v12 = vpop.f32.mrb[10].mxu1 }
  0xf0   :  { %v602_v13 = vpack.c.bf16 %v274_v5, %v274_v5  ;;  %v618_v14 = vpack.c.bf16 %v338_v6, %v338_v6  ;;  %v277_v15 = vadd.f32 %v657_v11, %v793_v18  ;;  %v341_v16 = vadd.f32 %v673_v12, %v793_v18  ;;  %v268_v17 = vpop.f32.mrb[11].mxu0  ;;  %v332_v19 = vpop.f32.mrb[11].mxu1 }
  0xf1   :  { %v600_v20 = vpack.c.bf16 %v266_v9, %v266_v9  ;;  %v616_v21 = vpack.c.bf16 %v330_v10, %v330_v10  ;;  %v269_v22 = vadd.f32 %v793_v18, %v268_v17  ;;  %v333_v23 = vadd.f32 %v793_v18, %v332_v19 }
  0xf2   :  { %499 = vst.msk [vmem:[%s958_s3 + $0x28] sm:$0xf] %vm488_vm1, %v602_v13  ;;  %515 = vst.msk [vmem:[%s958_s3 + $0x68] sm:$0xf] %vm488_vm1, %v618_v14  ;;  %v603_v24 = vpack.c.bf16 %v277_v15, %v277_v15  ;;  %v619_v25 = vpack.c.bf16 %v341_v16, %v341_v16 }
  0xf3   :  { %497 = vst.msk [vmem:[%s958_s3 + $0x20] sm:$0xf] %vm488_vm1, %v600_v20  ;;  %513 = vst.msk [vmem:[%s958_s3 + $0x60] sm:$0xf] %vm488_vm1, %v616_v21  ;;  %v601_v26 = vpack.c.bf16 %v269_v22, %v269_v22  ;;  %v617_v27 = vpack.c.bf16 %v333_v23, %v333_v23 }
  0xf4   :  { %500 = vst.msk [vmem:[%s958_s3 + $0x2c] sm:$0xf] %vm488_vm1, %v603_v24  ;;  %516 = vst.msk [vmem:[%s958_s3 + $0x6c] sm:$0xf] %vm488_vm1, %v619_v25 }
  0xf5   :  { %498 = vst.msk [vmem:[%s958_s3 + $0x24] sm:$0xf] %vm488_vm1, %v601_v26  ;;  %514 = vst.msk [vmem:[%s958_s3 + $0x64] sm:$0xf] %vm488_vm1, %v617_v27  ;;  %v660_v28 = vpop.f32.mrb[12].mxu0  ;;  %v676_v29 = vpop.f32.mrb[12].mxu1 }
  0xf6   :  { %v290_v30 = vadd.f32 %v660_v28, %v793_v18  ;;  %v354_v31 = vadd.f32 %v676_v29, %v793_v18  ;;  %v281_v32 = vpop.f32.mrb[13].mxu0  ;;  %v345_v33 = vpop.f32.mrb[13].mxu1 }
  0xf7   :  { %v282_v34 = vadd.f32 %v793_v18, %v281_v32  ;;  %v346_v35 = vadd.f32 %v793_v18, %v345_v33  ;;  %v661_v36 = vpop.f32.mrb[14].mxu0  ;;  %v677_v37 = vpop.f32.mrb[14].mxu1 }
  0xf8   :  { %v606_v38 = vpack.c.bf16 %v290_v30, %v290_v30  ;;  %v622_v39 = vpack.c.bf16 %v354_v31, %v354_v31  ;;  %v293_v40 = vadd.f32 %v661_v36, %v793_v18  ;;  %v357_v41 = vadd.f32 %v677_v37, %v793_v18  ;;  %v284_v42 = vpop.f32.mrb[15].mxu0  ;;  %v348_v43 = vpop.f32.mrb[15].mxu1 }
  0xf9   :  { %v604_v44 = vpack.c.bf16 %v282_v34, %v282_v34  ;;  %v620_v45 = vpack.c.bf16 %v346_v35, %v346_v35  ;;  %v285_v46 = vadd.f32 %v793_v18, %v284_v42  ;;  %v349_v47 = vadd.f32 %v793_v18, %v348_v43 }
  0xfa   :  { %503 = vst.msk [vmem:[%s958_s3 + $0x38] sm:$0xf] %vm488_vm1, %v606_v38  ;;  %519 = vst.msk [vmem:[%s958_s3 + $0x78] sm:$0xf] %vm488_vm1, %v622_v39  ;;  %v607_v48 = vpack.c.bf16 %v293_v40, %v293_v40  ;;  %v623_v49 = vpack.c.bf16 %v357_v41, %v357_v41 }
  0xfb   :  { %501 = vst.msk [vmem:[%s958_s3 + $0x30] sm:$0xf] %vm488_vm1, %v604_v44  ;;  %517 = vst.msk [vmem:[%s958_s3 + $0x70] sm:$0xf] %vm488_vm1, %v620_v45  ;;  %v605_v18 = vpack.c.bf16 %v285_v46, %v285_v46  ;;  %v621_v50 = vpack.c.bf16 %v349_v47, %v349_v47 }
  0xfc   :  { %504 = vst.msk [vmem:[%s958_s3 + $0x3c] sm:$0xf] %vm488_vm1, %v607_v48  ;;  %520 = vst.msk [vmem:[%s958_s3 + $0x7c] sm:$0xf] %vm488_vm1, %v623_v49 }
  0xfd   :  { %502 = vst.msk [vmem:[%s958_s3 + $0x34] sm:$0xf] %vm488_vm1, %v605_v18  ;;  %518 = vst.msk [vmem:[%s958_s3 + $0x74] sm:$0xf] %vm488_vm1, %v621_v50 }

// kernel: surgical_dino_forward.19
= control target key start
LH: loop header
LB: loop body
LE: loop exit
PB: predicated region body
PF: predicated region fallthrough
CT: control target
= control target key end

     0   :  { %vm150_vm0 = vcmask 261120   ;;  %s1602_s1 = inlined_call_operand.vmem [shape: bf16[32,128], index: 1, kind: input, shape index: {}]   ;;  %s1603_s0 = inlined_call_operand.vmem [shape: bf16[256,32], index: 0, kind: input, shape index: {}]   ;;  %s1604_s2 = inlined_call_operand.vmem [shape: f32[1,128], index: 2, kind: input, shape index: {}]   ;;  %s1605_s3 = inlined_call_operand.vmem [shape: bf16[256,128], index: 3, kind: output, shape index: {}]  }
   0x1   :  { %v1064_v0 = vld [vmem:[%s1602_s1] sm:$0xff]   ;;  %v1065_v1 = vld [vmem:[%s1602_s1 + $0x8] sm:$0xff]   ;;  %v1070_v6 = vld [vmem:[%s1603_s0 + $0x10] sm:$0xff]  }
   0x2   :  { %1024 = vmatprep.subr.bf16.mxu0 %v1064_v0  ;;  %1060 = vmatprep.subr.bf16.mxu1 %v1064_v0  ;;  %v1066_v2 = vld [vmem:[%s1603_s0] sm:$0xff]   ;;  %v1068_v4 = vld [vmem:[%s1603_s0 + $0x8] sm:$0xff]   ;;  %v1071_v7 = vld [vmem:[%s1603_s0 + $0x50] sm:$0xff]  }
   0x3   :  { %1025 = vmatpush3.bf16.msra.mxu0 %v1064_v0  ;;  %1062 = vmatpush3.bf16.msra.mxu1 %v1064_v0  ;;  %v1067_v3 = vld [vmem:[%s1603_s0 + $0x40] sm:$0xff]   ;;  %v1069_v5 = vld [vmem:[%s1603_s0 + $0x48] sm:$0xff]   ;;  %v1072_v8 = vld [vmem:[%s1603_s0 + $0x18] sm:$0xff]  }
   0x4   :  { %1026 = vmatprep.subr.bf16.mxu0 %v1065_v1  ;;  %1061 = vmatprep.subr.bf16.mxu1 %v1065_v1  ;;  %v1073_v9 = vld [vmem:[%s1603_s0 + $0x58] sm:$0xff]   ;;  %v1074_v10 = vld [vmem:[%s1603_s0 + $0x20] sm:$0xff]   ;;  %v1076_v12 = vld [vmem:[%s1603_s0 + $0x28] sm:$0xff]  }
   0x5   :  { %1028 = vmatprep.mubr.msk.bf16.mxu0 %vm150_vm0, %v1066_v2  ;;  %1044 = vmatprep.mubr.msk.bf16.mxu1 %vm150_vm0, %v1067_v3  ;;  %v1075_v11 = vld [vmem:[%s1603_s0 + $0x60] sm:$0xff]   ;;  %v1077_v13 = vld [vmem:[%s1603_s0 + $0x68] sm:$0xff]   ;;  %v1078_v14 = vld [vmem:[%s1603_s0 + $0x30] sm:$0xff]  }
   0x6   :  { %v1079_v15 = vld [vmem:[%s1603_s0 + $0x70] sm:$0xff]   ;;  %v1080_v16 = vld [vmem:[%s1603_s0 + $0x38] sm:$0xff]   ;;  %v1239_v18 = vld [vmem:[%s1604_s2] ss:$0 sm:$0xff] }
   0x7   :  { %1027 = vmatpush3.bf16.msra.mxu0 %v1065_v1  ;;  %1063 = vmatpush3.bf16.msra.mxu1 %v1065_v1  ;;  %v1081_v17 = vld [vmem:[%s1603_s0 + $0x78] sm:$0xff]  }
   0xa   :  { %1029 = vmatmul.mubr.msk.bf16.vlgmr.msra.gmra.mrb[0].mxu0 %vm150_vm0, %v1068_v4  ;;  %1045 = vmatmul.mubr.msk.bf16.vlgmr.msra.gmra.mrb[0].mxu1 %vm150_vm0, %v1069_v5 }
   0xb   :  { %1032 = vmatprep.mubr.msk.bf16.mxu0 %vm150_vm0, %v1070_v6  ;;  %1048 = vmatprep.mubr.msk.bf16.mxu1 %vm150_vm0, %v1071_v7 }
  0x12   :  { %1033 = vmatmul.mubr.msk.bf16.gmra.mrb[4].mxu0 %vm150_vm0, %v1072_v8  ;;  %1049 = vmatmul.mubr.msk.bf16.gmra.mrb[4].mxu1 %vm150_vm0, %v1073_v9 }
  0x13   :  { %1036 = vmatprep.mubr.msk.bf16.mxu0 %vm150_vm0, %v1074_v10  ;;  %1052 = vmatprep.mubr.msk.bf16.mxu1 %vm150_vm0, %v1075_v11 }
  0x1a   :  { %1037 = vmatmul.mubr.msk.bf16.gmra.mrb[8].mxu0 %vm150_vm0, %v1076_v12  ;;  %1053 = vmatmul.mubr.msk.bf16.gmra.mrb[8].mxu1 %vm150_vm0, %v1077_v13 }
  0x1b   :  { %1040 = vmatprep.mubr.msk.bf16.mxu0 %vm150_vm0, %v1078_v14  ;;  %1056 = vmatprep.mubr.msk.bf16.mxu1 %vm150_vm0, %v1079_v15 }
  0x22   :  { %1041 = vmatmul.mubr.msk.bf16.gmra.mrb[12].mxu0 %vm150_vm0, %v1080_v16  ;;  %1057 = vmatmul.mubr.msk.bf16.gmra.mrb[12].mxu1 %vm150_vm0, %v1081_v17 }
  0xdd   :  { %v1030_v19 = vpop.f32.mrb[0].mxu0  ;;  %v1046_v20 = vpop.f32.mrb[0].mxu1 }
  0xde   :  { %v1242_v21 = vadd.f32 %v1030_v19, %v1239_v18  ;;  %v1245_v22 = vadd.f32 %v1046_v20, %v1239_v18  ;;  %v233_v23 = vpop.f32.mrb[1].mxu0  ;;  %v297_v24 = vpop.f32.mrb[1].mxu1 }
  0xdf   :  { %v1248_v25 = vadd.f32 %v1239_v18, %v233_v23  ;;  %v1251_v26 = vadd.f32 %v1239_v18, %v297_v24  ;;  %v1031_v27 = vpop.f32.mrb[2].mxu0  ;;  %v1047_v28 = vpop.f32.mrb[2].mxu1 }
  0xe0   :  { %v362_v29 = vmul.f32 %v1242_v21, %v1242_v21  ;;  %v378_v30 = vmul.f32 %v1245_v22, %v1245_v22  ;;  %v1258_v31 = vadd.f32 %v1031_v27, %v1239_v18  ;;  %v1261_v32 = vadd.f32 %v1047_v28, %v1239_v18  ;;  %v236_v33 = vpop.f32.mrb[3].mxu0  ;;  %v300_v34 = vpop.f32.mrb[3].mxu1 }
  0xe1   :  { %v360_v35 = vmul.f32 %v1248_v25, %v1248_v25  ;;  %v376_v36 = vmul.f32 %v1251_v26, %v1251_v26  ;;  %v1268_v37 = vadd.f32 %v1239_v18, %v236_v33  ;;  %v1271_v38 = vadd.f32 %v1239_v18, %v300_v34 }
  0xe2   :  { %v394_v39 = vmul.f32 %v362_v29, %v1242_v21  ;;  %v410_v40 = vmul.f32 %v378_v30, %v1245_v22  ;;  %v363_v41 = vmul.f32 %v1258_v31, %v1258_v31  ;;  %v379_v42 = vmul.f32 %v1261_v32, %v1261_v32 }
  0xe3   :  { %v392_v43 = vmul.f32 %v360_v35, %v1248_v25  ;;  %v408_v44 = vmul.f32 %v376_v36, %v1251_v26  ;;  %v361_v45 = vmul.f32 %v1268_v37, %v1268_v37  ;;  %v377_v46 = vmul.f32 %v1271_v38, %v1271_v38 }
  0xe4   :  { %v426_v47 = vmul.f32 0.044715, %v394_v39  ;;  %v442_v48 = vmul.f32 0.044715, %v410_v40  ;;  %v395_v49 = vmul.f32 %v363_v41, %v1258_v31  ;;  %v411_v50 = vmul.f32 %v379_v42, %v1261_v32 }
  0xe5   :  { %v424_v51 = vmul.f32 0.044715, %v392_v43  ;;  %v440_v52 = vmul.f32 0.044715, %v408_v44  ;;  %v393_v53 = vmul.f32 %v361_v45, %v1268_v37  ;;  %v409_v54 = vmul.f32 %v377_v46, %v1271_v38  ;;  %v1034_v55 = vpop.f32.mrb[4].mxu0  ;;  %v1050_v56 = vpop.f32.mrb[4].mxu1 }
  0xe6   :  { %v458_v57 = vadd.f32 %v426_v47, %v1242_v21  ;;  %v474_v58 = vadd.f32 %v442_v48, %v1245_v22  ;;  %v427_v59 = vmul.f32 0.044715, %v395_v49  ;;  %v443_v60 = vmul.f32 0.044715, %v411_v50  ;;  %v249_v61 = vpop.f32.mrb[5].mxu0  ;;  %v313_v62 = vpop.f32.mrb[5].mxu1 }
  0xe7   :  { %v456_v63 = vadd.f32 %v424_v51, %v1248_v25  ;;  %v472_v0 = vadd.f32 %v440_v52, %v1251_v26  ;;  %v425_v1 = vmul.f32 0.044715, %v393_v53  ;;  %v441_v2 = vmul.f32 0.044715, %v409_v54  ;;  %v1035_v3 = vpop.f32.mrb[6].mxu0  ;;  %v1051_v4 = vpop.f32.mrb[6].mxu1 }
  0xe8   :  { %v490_v5 = vmul.f32 0.7978846, %v458_v57  ;;  %v506_v6 = vmul.f32 0.7978846, %v474_v58  ;;  %v459_v7 = vadd.f32 %v427_v59, %v1258_v31  ;;  %v475_v8 = vadd.f32 %v443_v60, %v1261_v32  ;;  %v252_v9 = vpop.f32.mrb[7].mxu0  ;;  %v316_v10 = vpop.f32.mrb[7].mxu1 }
  0xe9   :  { %v488_v11 = vmul.f32 0.7978846, %v456_v63  ;;  %v504_v12 = vmul.f32 0.7978846, %v472_v0  ;;  %v457_v13 = vadd.f32 %v425_v1, %v1268_v37  ;;  %v473_v14 = vadd.f32 %v441_v2, %v1271_v38 }
  0xea   :  { %1082 = vtanh.f32 %v490_v5  ;;  %v491_v15 = vmul.f32 0.7978846, %v459_v7  ;;  %v507_v16 = vmul.f32 0.7978846, %v475_v8  ;;  %v1298_v17 = vadd.f32 %v1034_v55, %v1239_v18 }
  0xeb   :  { %1084 = vtanh.f32 %v506_v6  ;;  %v489_v19 = vmul.f32 0.7978846, %v457_v13  ;;  %v505_v20 = vmul.f32 0.7978846, %v473_v14  ;;  %v1301_v23 = vadd.f32 %v1050_v56, %v1239_v18 }
  0xec   :  { %1086 = vtanh.f32 %v488_v11  ;;  %v366_v24 = vmul.f32 %v1298_v17, %v1298_v17  ;;  %v1306_v27 = vadd.f32 %v1239_v18, %v249_v61  ;;  %v1309_v28 = vadd.f32 %v1239_v18, %v313_v62 }
  0xed   :  { %1088 = vtanh.f32 %v504_v12  ;;  %v382_v29 = vmul.f32 %v1301_v23, %v1301_v23  ;;  %v1314_v30 = vadd.f32 %v1035_v3, %v1239_v18  ;;  %v1317_v33 = vadd.f32 %v1051_v4, %v1239_v18  ;;  %v1319_v34 = vpop.f32.mrb[8].mxu0  ;;  %v1321_v35 = vpop.f32.mrb[8].mxu1 }
  0xee   :  { %1090 = vtanh.f32 %v491_v15  ;;  %v398_v36 = vmul.f32 %v366_v24, %v1298_v17  ;;  %v364_v39 = vmul.f32 %v1306_v27, %v1306_v27  ;;  %v380_v40 = vmul.f32 %v1309_v28, %v1309_v28  ;;  %v1328_v41 = vpop.f32.mrb[9].mxu0  ;;  %v1330_v42 = vpop.f32.mrb[9].mxu1 }
  0xef   :  { %1092 = vtanh.f32 %v507_v16  ;;  %v414_v43 = vmul.f32 %v382_v29, %v1301_v23  ;;  %v367_v44 = vmul.f32 %v1314_v30, %v1314_v30  ;;  %v383_v45 = vmul.f32 %v1317_v33, %v1317_v33  ;;  %v1337_v46 = vpop.f32.mrb[10].mxu0  ;;  %v1339_v47 = vpop.f32.mrb[10].mxu1 }
  0xf0   :  { %1094 = vtanh.f32 %v489_v19  ;;  %v430_v48 = vmul.f32 0.044715, %v398_v36  ;;  %v396_v49 = vmul.f32 %v364_v39, %v1306_v27  ;;  %v412_v50 = vmul.f32 %v380_v40, %v1309_v28  ;;  %v1343_v51 = vpop.f32.mrb[11].mxu0  ;;  %v1345_v52 = vpop.f32.mrb[11].mxu1 }
  0xf1   :  { %1096 = vtanh.f32 %v505_v20  ;;  %v446_v53 = vmul.f32 0.044715, %v414_v43  ;;  %v399_v54 = vmul.f32 %v367_v44, %v1314_v30  ;;  %v415_v55 = vmul.f32 %v383_v45, %v1317_v33 }
  0xf2   :  { %v462_v56 = vadd.f32 %v430_v48, %v1298_v17  ;;  %v428_v57 = vmul.f32 0.044715, %v396_v49  ;;  %v444_v58 = vmul.f32 0.044715, %v412_v50  ;;  %v1351_v59 = vadd.f32 %v1239_v18, %v252_v9 }
  0xf3   :  { %v478_v60 = vadd.f32 %v446_v53, %v1301_v23  ;;  %v431_v61 = vmul.f32 0.044715, %v399_v54  ;;  %v447_v62 = vmul.f32 0.044715, %v415_v55  ;;  %v1355_v63 = vadd.f32 %v1239_v18, %v316_v10 }
  0xf4   :  { %v1083_v0 = vpop.eup %1082  ;;  %v494_v1 = vmul.f32 0.7978846, %v462_v56  ;;  %v460_v2 = vadd.f32 %v428_v57, %v1306_v27  ;;  %v476_v3 = vadd.f32 %v444_v58, %v1309_v28  ;;  %v365_v4 = vmul.f32 %v1351_v59, %v1351_v59 }
  0xf5   :  { %v1085_v5 = vpop.eup %1084  ;;  %v554_v6 = vadd.f32 1.0, %v1083_v0  ;;  %v510_v7 = vmul.f32 0.7978846, %v478_v60  ;;  %v463_v8 = vadd.f32 %v431_v61, %v1314_v30  ;;  %v479_v9 = vadd.f32 %v447_v62, %v1317_v33  ;;  %v1363_v11 = vpop.f32.mrb[12].mxu0 }
  0xf6   :  { %v1365_v10 = vpop.f32.mrb[12].mxu1  ;;  %v1087_v12 = vpop.eup %1086  ;;  %v570_v13 = vadd.f32 1.0, %v1085_v5  ;;  %1098 = vtanh.f32 %v494_v1  ;;  %v492_v14 = vmul.f32 0.7978846, %v460_v2  ;;  %v508_v15 = vmul.f32 0.7978846, %v476_v3 }
  0xf7   :  { %v1367_v16 = vpop.f32.mrb[13].mxu0  ;;  %v1089_v19 = vpop.eup %1088  ;;  %v586_v20 = vmul.f32 0.5, %v554_v6  ;;  %v552_v24 = vadd.f32 1.0, %v1087_v12  ;;  %1100 = vtanh.f32 %v510_v7  ;;  %v495_v29 = vmul.f32 0.7978846, %v463_v8 }
  0xf8   :  { %v1369_v36 = vpop.f32.mrb[13].mxu1  ;;  %v1371_v39 = vpop.f32.mrb[14].mxu0  ;;  %v602_v43 = vmul.f32 0.5, %v570_v13  ;;  %v568_v44 = vadd.f32 1.0, %v1089_v19  ;;  %1102 = vtanh.f32 %v492_v14  ;;  %v511_v45 = vmul.f32 0.7978846, %v479_v9 }
  0xf9   :  { %v1091_v40 = vpop.eup %1090  ;;  %v1373_v48 = vpop.f32.mrb[14].mxu1  ;;  %v618_v53 = vmul.f32 %v586_v20, %v1242_v21  ;;  %v584_v54 = vmul.f32 0.5, %v552_v24  ;;  %1104 = vtanh.f32 %v508_v15  ;;  %v397_v6 = vmul.f32 %v365_v4, %v1351_v59 }
  0xfa   :  { %v1375_v49 = vpop.f32.mrb[15].mxu0  ;;  %v1093_v50 = vpop.eup %1092  ;;  %v555_v55 = vadd.f32 1.0, %v1091_v40  ;;  %v634_v58 = vmul.f32 %v602_v43, %v1245_v22  ;;  %v600_v60 = vmul.f32 0.5, %v568_v44  ;;  %1106 = vtanh.f32 %v495_v29 }
  0xfb   :  { %v1378_v56 = vpop.f32.mrb[15].mxu1  ;;  %v1095_v57 = vpop.eup %1094  ;;  %v571_v61 = vadd.f32 1.0, %v1093_v50  ;;  %v616_v0 = vmul.f32 %v584_v54, %v1248_v25  ;;  %1108 = vtanh.f32 %v511_v45  ;;  %v381_v22 = vmul.f32 %v1355_v63, %v1355_v63 }
  0xfc   :  { %v1097_v62 = vpop.eup %1096  ;;  %v587_v1 = vmul.f32 0.5, %v555_v55  ;;  %v553_v2 = vadd.f32 1.0, %v1095_v57  ;;  %v632_v3 = vmul.f32 %v600_v60, %v1251_v26  ;;  %v1389_v9 = vadd.f32 %v1319_v34, %v1239_v18 }
  0xfd   :  { %v603_v21 = vmul.f32 0.5, %v571_v61  ;;  %v569_v5 = vadd.f32 1.0, %v1097_v62  ;;  %v429_v13 = vmul.f32 0.044715, %v397_v6  ;;  %v1394_v26 = vadd.f32 %v1321_v35, %v1239_v18 }
  0xfe   :  { %v619_v7 = vmul.f32 %v587_v1, %v1258_v31  ;;  %v585_v8 = vmul.f32 0.5, %v553_v2  ;;  %v413_v31 = vmul.f32 %v381_v22, %v1355_v63  ;;  %v370_v15 = vmul.f32 %v1389_v9, %v1389_v9 }
  0xff   :  { %v635_v25 = vmul.f32 %v603_v21, %v1261_v32  ;;  %v601_v12 = vmul.f32 0.5, %v569_v5  ;;  %v461_v32 = vadd.f32 %v429_v13, %v1351_v59  ;;  %v386_v24 = vmul.f32 %v1394_v26, %v1394_v26 }
 0x100   :  { %v919_v14 = vpack.c.bf16 %v619_v7, %v618_v53  ;;  %v617_v4 = vmul.f32 %v585_v8, %v1268_v37  ;;  %v1099_v19 = vpop.eup %1098  ;;  %v445_v40 = vmul.f32 0.044715, %v413_v31  ;;  %v402_v43 = vmul.f32 %v370_v15, %v1389_v9 }
 0x101   :  { %v959_v20 = vpack.c.bf16 %v635_v25, %v634_v58  ;;  %v633_v34 = vmul.f32 %v601_v12, %v1271_v38  ;;  %v1101_v29 = vpop.eup %1100  ;;  %v558_v35 = vadd.f32 1.0, %v1099_v19  ;;  %v493_v50 = vmul.f32 0.7978846, %v461_v32 }
 0x102   :  { %991 = vst [vmem:[%s1605_s3 + $0x8] sm:$0xff] %v919_v14   ;;  %v914_v37 = vpack.c.bf16 %v617_v4, %v616_v0  ;;  %v1103_v44 = vpop.eup %1102  ;;  %v574_v45 = vadd.f32 1.0, %v1101_v29  ;;  %v418_v53 = vmul.f32 %v386_v24, %v1394_v26  ;;  %v477_v58 = vadd.f32 %v445_v40, %v1355_v63 }
 0x103   :  { %999 = vst [vmem:[%s1605_s3 + $0x48] sm:$0xff] %v959_v20   ;;  %v954_v38 = vpack.c.bf16 %v633_v34, %v632_v3  ;;  %v1105_v54 = vpop.eup %1104  ;;  %v590_v55 = vmul.f32 0.5, %v558_v35  ;;  %v556_v57 = vadd.f32 1.0, %v1103_v44  ;;  %v434_v60 = vmul.f32 0.044715, %v402_v43 }
 0x104   :  { %915 = vst [vmem:[%s1605_s3] sm:$0xff] %v914_v37   ;;  %v1107_v61 = vpop.eup %1106  ;;  %v606_v62 = vmul.f32 0.5, %v574_v45  ;;  %v572_v0 = vadd.f32 1.0, %v1105_v54  ;;  %1110 = vtanh.f32 %v493_v50  ;;  %v450_v1 = vmul.f32 0.044715, %v418_v53 }
 0x105   :  { %998 = vst [vmem:[%s1605_s3 + $0x40] sm:$0xff] %v954_v38   ;;  %v1109_v2 = vpop.eup %1108  ;;  %v622_v3 = vmul.f32 %v590_v55, %v1298_v17  ;;  %v588_v21 = vmul.f32 0.5, %v556_v57  ;;  %v559_v5 = vadd.f32 1.0, %v1107_v61  ;;  %v509_v6 = vmul.f32 0.7978846, %v477_v58 }
 0x106   :  { %v638_v7 = vmul.f32 %v606_v62, %v1301_v23  ;;  %v604_v8 = vmul.f32 0.5, %v572_v0  ;;  %v575_v22 = vadd.f32 1.0, %v1109_v2  ;;  %v466_v25 = vadd.f32 %v434_v60, %v1389_v9 }
 0x107   :  { %v1423_v12 = vmul.f32 %v588_v21, %v1306_v27  ;;  %v591_v13 = vmul.f32 0.5, %v559_v5  ;;  %1112 = vtanh.f32 %v509_v6  ;;  %v482_v14 = vadd.f32 %v450_v1, %v1394_v26 }
 0x108   :  { %v1427_v4 = vmul.f32 %v604_v8, %v1309_v28  ;;  %v607_v17 = vmul.f32 0.5, %v575_v22  ;;  %v498_v31 = vmul.f32 0.7978846, %v466_v25  ;;  %v1431_v15 = vadd.f32 %v1239_v18, %v1328_v41 }
 0x109   :  { %v623_v23 = vmul.f32 %v591_v13, %v1314_v30  ;;  %v514_v19 = vmul.f32 0.7978846, %v482_v14  ;;  %v1436_v27 = vadd.f32 %v1239_v18, %v1330_v42  ;;  %v1440_v20 = vadd.f32 %v1337_v46, %v1239_v18 }
 0x10a   :  { %v639_v28 = vmul.f32 %v607_v17, %v1317_v33  ;;  %1114 = vtanh.f32 %v498_v31  ;;  %v368_v34 = vmul.f32 %v1431_v15, %v1431_v15  ;;  %v1447_v41 = vadd.f32 %v1339_v47, %v1239_v18 }
 0x10b   :  { %v929_v30 = vpack.c.bf16 %v623_v23, %v622_v3  ;;  %1116 = vtanh.f32 %v514_v19  ;;  %v384_v42 = vmul.f32 %v1436_v27, %v1436_v27  ;;  %v371_v32 = vmul.f32 %v1440_v20, %v1440_v20 }
 0x10c   :  { %v969_v46 = vpack.c.bf16 %v639_v28, %v638_v7  ;;  %v400_v24 = vmul.f32 %v368_v34, %v1431_v15  ;;  %v387_v33 = vmul.f32 %v1447_v41, %v1447_v41  ;;  %v1458_v29 = vadd.f32 %v1239_v18, %v1343_v51 }
 0x10d   :  { %993 = vst [vmem:[%s1605_s3 + $0x18] sm:$0xff] %v929_v30   ;;  %v416_v47 = vmul.f32 %v384_v42, %v1436_v27  ;;  %v403_v37 = vmul.f32 %v371_v32, %v1440_v20  ;;  %v1467_v35 = vadd.f32 %v1239_v18, %v1345_v52  ;;  %v1471_v40 = vadd.f32 %v1363_v11, %v1239_v18 }
 0x10e   :  { %v1111_v43 = vpop.eup %1110  ;;  %1001 = vst [vmem:[%s1605_s3 + $0x58] sm:$0xff] %v969_v46   ;;  %v432_v51 = vmul.f32 0.044715, %v400_v24  ;;  %v419_v44 = vmul.f32 %v387_v33, %v1447_v41  ;;  %v369_v38 = vmul.f32 %v1458_v29, %v1458_v29  ;;  %v1481_v45 = vadd.f32 %v1365_v10, %v1239_v18 }
 0x10f   :  { %v557_v52 = vadd.f32 1.0, %v1111_v43  ;;  %v448_v50 = vmul.f32 0.044715, %v416_v47  ;;  %v435_v53 = vmul.f32 0.044715, %v403_v37  ;;  %v385_v11 = vmul.f32 %v1467_v35, %v1467_v35 }
 0x110   :  { %v464_v54 = vadd.f32 %v432_v51, %v1431_v15  ;;  %v451_v55 = vmul.f32 0.044715, %v419_v44  ;;  %v401_v57 = vmul.f32 %v369_v38, %v1458_v29  ;;  %v374_v58 = vmul.f32 %v1471_v40, %v1471_v40 }
 0x111   :  { %v1113_v60 = vpop.eup %1112  ;;  %v589_v61 = vmul.f32 0.5, %v557_v52  ;;  %v480_v62 = vadd.f32 %v448_v50, %v1436_v27  ;;  %v467_v10 = vadd.f32 %v435_v53, %v1440_v20  ;;  %v417_v0 = vmul.f32 %v385_v11, %v1467_v35 }
 0x112   :  { %v573_v1 = vadd.f32 1.0, %v1113_v60  ;;  %v496_v2 = vmul.f32 0.7978846, %v464_v54  ;;  %v483_v3 = vadd.f32 %v451_v55, %v1447_v41  ;;  %v433_v21 = vmul.f32 0.044715, %v401_v57 }
 0x113   :  { %v621_v5 = vmul.f32 %v589_v61, %v1351_v59  ;;  %v512_v6 = vmul.f32 0.7978846, %v480_v62  ;;  %v499_v7 = vmul.f32 0.7978846, %v467_v10  ;;  %v449_v8 = vmul.f32 0.044715, %v417_v0 }
 0x114   :  { %v1115_v22 = vpop.eup %1114  ;;  %v605_v25 = vmul.f32 0.5, %v573_v1  ;;  %1118 = vtanh.f32 %v496_v2  ;;  %v515_v13 = vmul.f32 0.7978846, %v483_v3  ;;  %v465_v14 = vadd.f32 %v433_v21, %v1458_v29 }
 0x115   :  { %v1117_v17 = vpop.eup %1116  ;;  %v924_v31 = vpack.c.bf16 %v621_v5, %v1423_v12  ;;  %v562_v23 = vadd.f32 1.0, %v1115_v22  ;;  %1120 = vtanh.f32 %v512_v6  ;;  %v481_v19 = vadd.f32 %v449_v8, %v1467_v35 }
 0x116   :  { %v637_v28 = vmul.f32 %v605_v25, %v1355_v63  ;;  %v578_v34 = vadd.f32 1.0, %v1117_v17  ;;  %1122 = vtanh.f32 %v499_v7  ;;  %v497_v59 = vmul.f32 0.7978846, %v465_v14 }
 0x117   :  { %992 = vst [vmem:[%s1605_s3 + $0x10] sm:$0xff] %v924_v31   ;;  %v594_v30 = vmul.f32 0.5, %v562_v23  ;;  %1124 = vtanh.f32 %v515_v13  ;;  %v513_v42 = vmul.f32 0.7978846, %v481_v19  ;;  %v406_v32 = vmul.f32 %v374_v58, %v1471_v40 }
 0x118   :  { %v964_v12 = vpack.c.bf16 %v637_v28, %v1427_v4  ;;  %1126 = vtanh.f32 %v497_v59  ;;  %v390_v46 = vmul.f32 %v1481_v45, %v1481_v45  ;;  %v610_v24 = vmul.f32 0.5, %v578_v34 }
 0x119   :  { %1128 = vtanh.f32 %v513_v42  ;;  %v438_v63 = vmul.f32 0.044715, %v406_v32  ;;  %v1507_v33 = vadd.f32 %v1239_v18, %v1367_v16  ;;  %v1513_v47 = vmul.f32 %v594_v30, %v1389_v9 }
 0x11a   :  { %1000 = vst [vmem:[%s1605_s3 + $0x50] sm:$0xff] %v964_v12   ;;  %v422_v4 = vmul.f32 %v390_v46, %v1481_v45  ;;  %v1518_v37 = vadd.f32 %v1239_v18, %v1369_v36  ;;  %v1522_v43 = vadd.f32 %v1371_v39, %v1239_v18  ;;  %v1529_v44 = vadd.f32 %v1373_v48, %v1239_v18 }
 0x11b   :  { %v470_v16 = vadd.f32 %v438_v63, %v1471_v40  ;;  %v372_v51 = vmul.f32 %v1507_v33, %v1507_v33  ;;  %v1533_v9 = vadd.f32 %v1239_v18, %v1375_v49  ;;  %v1541_v52 = vadd.f32 %v1239_v18, %v1378_v56 }
 0x11c   :  { %v454_v38 = vmul.f32 0.044715, %v422_v4  ;;  %v388_v36 = vmul.f32 %v1518_v37, %v1518_v37  ;;  %v375_v39 = vmul.f32 %v1522_v43, %v1522_v43  ;;  %v642_v50 = vmul.f32 %v610_v24, %v1394_v26 }
 0x11d   :  { %v502_v53 = vmul.f32 0.7978846, %v470_v16  ;;  %v404_v48 = vmul.f32 %v372_v51, %v1507_v33  ;;  %v391_v49 = vmul.f32 %v1529_v44, %v1529_v44  ;;  %v373_v58 = vmul.f32 %v1533_v9, %v1533_v9 }
 0x11e   :  { %v1119_v11 = vpop.eup %1118  ;;  %v486_v54 = vadd.f32 %v454_v38, %v1481_v45  ;;  %v420_v55 = vmul.f32 %v388_v36, %v1518_v37  ;;  %v407_v57 = vmul.f32 %v375_v39, %v1522_v43  ;;  %v389_v60 = vmul.f32 %v1541_v52, %v1541_v52 }
 0x11f   :  { %v1121_v18 = vpop.eup %1120  ;;  %v560_v56 = vadd.f32 1.0, %v1119_v11  ;;  %1130 = vtanh.f32 %v502_v53  ;;  %v436_v26 = vmul.f32 0.044715, %v404_v48  ;;  %v423_v1 = vmul.f32 %v391_v49, %v1529_v44 }
 0x120   :  { %v1123_v61 = vpop.eup %1122  ;;  %v576_v62 = vadd.f32 1.0, %v1121_v18  ;;  %v518_v10 = vmul.f32 0.7978846, %v486_v54  ;;  %v452_v0 = vmul.f32 0.044715, %v420_v55  ;;  %v405_v13 = vmul.f32 %v373_v58, %v1533_v9 }
 0x121   :  { %v1125_v2 = vpop.eup %1124  ;;  %v592_v3 = vmul.f32 0.5, %v560_v56  ;;  %v563_v21 = vadd.f32 1.0, %v1123_v61  ;;  %v468_v5 = vadd.f32 %v436_v26, %v1507_v33  ;;  %v439_v6 = vmul.f32 0.044715, %v407_v57 }
 0x122   :  { %v1127_v7 = vpop.eup %1126  ;;  %v608_v8 = vmul.f32 0.5, %v576_v62  ;;  %v579_v22 = vadd.f32 1.0, %v1125_v2  ;;  %v484_v25 = vadd.f32 %v452_v0, %v1518_v37  ;;  %1132 = vtanh.f32 %v518_v10 }
 0x123   :  { %v1129_v14 = vpop.eup %1128  ;;  %v595_v17 = vmul.f32 0.5, %v563_v21  ;;  %v561_v31 = vadd.f32 1.0, %v1127_v7  ;;  %v500_v23 = vmul.f32 0.7978846, %v468_v5  ;;  %v624_v19 = vmul.f32 %v592_v3, %v1431_v15 }
 0x124   :  { %v640_v28 = vmul.f32 %v608_v8, %v1436_v27  ;;  %v611_v34 = vmul.f32 0.5, %v579_v22  ;;  %v577_v59 = vadd.f32 1.0, %v1129_v14  ;;  %v516_v32 = vmul.f32 0.7978846, %v484_v25 }
 0x125   :  { %v627_v30 = vmul.f32 %v595_v17, %v1440_v20  ;;  %v593_v42 = vmul.f32 0.5, %v561_v31  ;;  %v471_v12 = vadd.f32 %v439_v6, %v1522_v43  ;;  %1134 = vtanh.f32 %v500_v23 }
 0x126   :  { %v643_v46 = vmul.f32 %v611_v34, %v1447_v41  ;;  %v609_v24 = vmul.f32 0.5, %v577_v59  ;;  %v455_v63 = vmul.f32 0.044715, %v423_v1  ;;  %v437_v51 = vmul.f32 0.044715, %v405_v13 }
 0x127   :  { %v939_v4 = vpack.c.bf16 %v627_v30, %v1513_v47  ;;  %v625_v16 = vmul.f32 %v593_v42, %v1458_v29  ;;  %v503_v15 = vmul.f32 0.7978846, %v471_v12  ;;  %v421_v36 = vmul.f32 %v389_v60, %v1541_v52 }
 0x128   :  { %v979_v27 = vpack.c.bf16 %v643_v46, %v642_v50  ;;  %v641_v38 = vmul.f32 %v609_v24, %v1467_v35  ;;  %v487_v20 = vadd.f32 %v455_v63, %v1529_v44  ;;  %v469_v47 = vadd.f32 %v437_v51, %v1533_v9 }
 0x129   :  { %v1131_v39 = vpop.eup %1130  ;;  %995 = vst [vmem:[%s1605_s3 + $0x28] sm:$0xff] %v939_v4   ;;  %v934_v41 = vpack.c.bf16 %v625_v16, %v624_v19  ;;  %1136 = vtanh.f32 %v503_v15  ;;  %v453_v50 = vmul.f32 0.044715, %v421_v36 }
 0x12a   :  { %1003 = vst [vmem:[%s1605_s3 + $0x68] sm:$0xff] %v979_v27   ;;  %v974_v29 = vpack.c.bf16 %v641_v38, %v640_v28  ;;  %1138 = vtanh.f32 %v516_v32  ;;  %v519_v35 = vmul.f32 0.7978846, %v487_v20  ;;  %v501_v53 = vmul.f32 0.7978846, %v469_v47 }
 0x12b   :  { %994 = vst [vmem:[%s1605_s3 + $0x20] sm:$0xff] %v934_v41   ;;  %v485_v48 = vadd.f32 %v453_v50, %v1541_v52  ;;  %v566_v55 = vadd.f32 1.0, %v1131_v39 }
 0x12c   :  { %1002 = vst [vmem:[%s1605_s3 + $0x60] sm:$0xff] %v974_v29   ;;  %1140 = vtanh.f32 %v519_v35  ;;  %v1133_v49 = vpop.eup %1132 }
 0x12d   :  { %1142 = vtanh.f32 %v501_v53  ;;  %v517_v11 = vmul.f32 0.7978846, %v485_v48  ;;  %v582_v58 = vadd.f32 1.0, %v1133_v49  ;;  %v598_v56 = vmul.f32 0.5, %v566_v55 }
 0x12f   :  { %v1135_v54 = vpop.eup %1134  ;;  %1144 = vtanh.f32 %v517_v11  ;;  %v614_v0 = vmul.f32 0.5, %v582_v58  ;;  %v630_v3 = vmul.f32 %v598_v56, %v1471_v40 }
 0x130   :  { %v564_v26 = vadd.f32 1.0, %v1135_v54 }
 0x131   :  { %v646_v13 = vmul.f32 %v614_v0, %v1481_v45 }
 0x132   :  { %v596_v21 = vmul.f32 0.5, %v564_v26 }
 0x133   :  { %v1137_v57 = vpop.eup %1136 }
 0x134   :  { %v1139_v18 = vpop.eup %1138  ;;  %v567_v60 = vadd.f32 1.0, %v1137_v57  ;;  %v628_v23 = vmul.f32 %v596_v21, %v1507_v33 }
 0x135   :  { %v580_v1 = vadd.f32 1.0, %v1139_v18 }
 0x136   :  { %v1141_v61 = vpop.eup %1140  ;;  %v599_v62 = vmul.f32 0.5, %v567_v60 }
 0x137   :  { %v1143_v10 = vpop.eup %1142  ;;  %v583_v2 = vadd.f32 1.0, %v1141_v61  ;;  %v612_v14 = vmul.f32 0.5, %v580_v1 }
 0x138   :  { %v631_v5 = vmul.f32 %v599_v62, %v1522_v43  ;;  %v565_v6 = vadd.f32 1.0, %v1143_v10 }
 0x139   :  { %v615_v7 = vmul.f32 0.5, %v583_v2  ;;  %v1145_v8 = vpop.eup %1144  ;;  %v644_v34 = vmul.f32 %v612_v14, %v1518_v37 }
 0x13a   :  { %v949_v22 = vpack.c.bf16 %v631_v5, %v630_v3  ;;  %v597_v25 = vmul.f32 0.5, %v565_v6  ;;  %v581_v31 = vadd.f32 1.0, %v1145_v8 }
 0x13b   :  { %v647_v17 = vmul.f32 %v615_v7, %v1529_v44 }
 0x13c   :  { %997 = vst [vmem:[%s1605_s3 + $0x38] sm:$0xff] %v949_v22   ;;  %v629_v40 = vmul.f32 %v597_v25, %v1533_v9  ;;  %v613_v19 = vmul.f32 0.5, %v581_v31 }
 0x13d   :  { %v989_v43 = vpack.c.bf16 %v647_v17, %v646_v13 }
 0x13e   :  { %v944_v28 = vpack.c.bf16 %v629_v40, %v628_v23  ;;  %v645_v45 = vmul.f32 %v613_v19, %v1541_v52 }
 0x13f   :  { %1005 = vst [vmem:[%s1605_s3 + $0x78] sm:$0xff] %v989_v43  }
 0x140   :  { %996 = vst [vmem:[%s1605_s3 + $0x30] sm:$0xff] %v944_v28   ;;  %v984_v33 = vpack.c.bf16 %v645_v45, %v644_v34 }
 0x142   :  { %1004 = vst [vmem:[%s1605_s3 + $0x70] sm:$0xff] %v984_v33  }

// kernel: surgical_dino_forward.18
= control target key start
LH: loop header
LB: loop body
LE: loop exit
PB: predicated region body
PF: predicated region fallthrough
CT: control target
= control target key end

     0   :  { %vm150_vm0 = vcmask 261120   ;;  %s762_s1 = inlined_call_operand.vmem [shape: bf16[32,32], index: 1, kind: input, shape index: {}]   ;;  %s763_s0 = inlined_call_operand.vmem [shape: bf16[256,32], index: 0, kind: input, shape index: {}]   ;;  %s764_s2 = inlined_call_operand.vmem [shape: f32[1,32], index: 2, kind: input, shape index: {}]   ;;  %s765_s3 = inlined_call_operand.vmem [shape: f32[256,32], index: 3, kind: output, shape index: {}]  }
   0x1   :  { %v489_v0 = vld [vmem:[%s762_s1] sm:$0xff]   ;;  %v490_v1 = vld [vmem:[%s762_s1 + $0x8] sm:$0xff]   ;;  %v495_v6 = vld [vmem:[%s763_s0 + $0x10] sm:$0xff]  }
   0x2   :  { %449 = vmatprep.subr.bf16.mxu0 %v489_v0  ;;  %485 = vmatprep.subr.bf16.mxu1 %v489_v0  ;;  %v491_v2 = vld [vmem:[%s763_s0] sm:$0xff]   ;;  %v493_v4 = vld [vmem:[%s763_s0 + $0x8] sm:$0xff]   ;;  %v496_v7 = vld [vmem:[%s763_s0 + $0x50] sm:$0xff]  }
   0x3   :  { %450 = vmatpush3.bf16.msra.mxu0 %v489_v0  ;;  %487 = vmatpush3.bf16.msra.mxu1 %v489_v0  ;;  %v492_v3 = vld [vmem:[%s763_s0 + $0x40] sm:$0xff]   ;;  %v494_v5 = vld [vmem:[%s763_s0 + $0x48] sm:$0xff]   ;;  %v497_v8 = vld [vmem:[%s763_s0 + $0x18] sm:$0xff]  }
   0x4   :  { %451 = vmatprep.subr.bf16.mxu0 %v490_v1  ;;  %486 = vmatprep.subr.bf16.mxu1 %v490_v1  ;;  %v498_v9 = vld [vmem:[%s763_s0 + $0x58] sm:$0xff]   ;;  %v499_v10 = vld [vmem:[%s763_s0 + $0x20] sm:$0xff]   ;;  %v501_v12 = vld [vmem:[%s763_s0 + $0x28] sm:$0xff]  }
   0x5   :  { %453 = vmatprep.mubr.msk.bf16.mxu0 %vm150_vm0, %v491_v2  ;;  %469 = vmatprep.mubr.msk.bf16.mxu1 %vm150_vm0, %v492_v3  ;;  %v500_v11 = vld [vmem:[%s763_s0 + $0x60] sm:$0xff]   ;;  %v502_v13 = vld [vmem:[%s763_s0 + $0x68] sm:$0xff]   ;;  %v503_v14 = vld [vmem:[%s763_s0 + $0x30] sm:$0xff]  }
   0x6   :  { %v504_v15 = vld [vmem:[%s763_s0 + $0x70] sm:$0xff]   ;;  %v505_v16 = vld [vmem:[%s763_s0 + $0x38] sm:$0xff]   ;;  %v600_v18 = vld [vmem:[%s764_s2] ss:$0 sm:$0xff] }
   0x7   :  { %452 = vmatpush3.bf16.msra.mxu0 %v490_v1  ;;  %488 = vmatpush3.bf16.msra.mxu1 %v490_v1  ;;  %v506_v17 = vld [vmem:[%s763_s0 + $0x78] sm:$0xff]  }
   0xa   :  { %454 = vmatmul.mubr.msk.bf16.vlgmr.msra.gmra.mrb[0].mxu0 %vm150_vm0, %v493_v4  ;;  %470 = vmatmul.mubr.msk.bf16.vlgmr.msra.gmra.mrb[0].mxu1 %vm150_vm0, %v494_v5 }
   0xb   :  { %457 = vmatprep.mubr.msk.bf16.mxu0 %vm150_vm0, %v495_v6  ;;  %473 = vmatprep.mubr.msk.bf16.mxu1 %vm150_vm0, %v496_v7 }
  0x12   :  { %458 = vmatmul.mubr.msk.bf16.gmra.mrb[4].mxu0 %vm150_vm0, %v497_v8  ;;  %474 = vmatmul.mubr.msk.bf16.gmra.mrb[4].mxu1 %vm150_vm0, %v498_v9 }
  0x13   :  { %461 = vmatprep.mubr.msk.bf16.mxu0 %vm150_vm0, %v499_v10  ;;  %477 = vmatprep.mubr.msk.bf16.mxu1 %vm150_vm0, %v500_v11 }
  0x1a   :  { %462 = vmatmul.mubr.msk.bf16.gmra.mrb[8].mxu0 %vm150_vm0, %v501_v12  ;;  %478 = vmatmul.mubr.msk.bf16.gmra.mrb[8].mxu1 %vm150_vm0, %v502_v13 }
  0x1b   :  { %465 = vmatprep.mubr.msk.bf16.mxu0 %vm150_vm0, %v503_v14  ;;  %481 = vmatprep.mubr.msk.bf16.mxu1 %vm150_vm0, %v504_v15 }
  0x22   :  { %466 = vmatmul.mubr.msk.bf16.gmra.mrb[12].mxu0 %vm150_vm0, %v505_v16  ;;  %482 = vmatmul.mubr.msk.bf16.gmra.mrb[12].mxu1 %vm150_vm0, %v506_v17 }
  0xdd   :  { %v455_v19 = vpop.f32.mrb[0].mxu0  ;;  %v471_v20 = vpop.f32.mrb[0].mxu1 }
  0xde   :  { %v242_v21 = vadd.f32 %v455_v19, %v600_v18  ;;  %v306_v22 = vadd.f32 %v471_v20, %v600_v18  ;;  %v233_v23 = vpop.f32.mrb[1].mxu0  ;;  %v297_v24 = vpop.f32.mrb[1].mxu1 }
  0xdf   :  { %v234_v25 = vadd.f32 %v600_v18, %v233_v23  ;;  %v298_v26 = vadd.f32 %v600_v18, %v297_v24  ;;  %v456_v27 = vpop.f32.mrb[2].mxu0  ;;  %v472_v28 = vpop.f32.mrb[2].mxu1 }
  0xe0   :  { %362 = vst.msk [vmem:[%s765_s3 + $0x10] sm:$0xff] %vm150_vm0, %v242_v21  ;;  %378 = vst.msk [vmem:[%s765_s3 + $0x90] sm:$0xff] %vm150_vm0, %v306_v22  ;;  %v245_v29 = vadd.f32 %v456_v27, %v600_v18  ;;  %v309_v30 = vadd.f32 %v472_v28, %v600_v18  ;;  %v236_v31 = vpop.f32.mrb[3].mxu0  ;;  %v300_v32 = vpop.f32.mrb[3].mxu1 }
  0xe1   :  { %360 = vst.msk [vmem:[%s765_s3] sm:$0xff] %vm150_vm0, %v234_v25  ;;  %376 = vst.msk [vmem:[%s765_s3 + $0x80] sm:$0xff] %vm150_vm0, %v298_v26  ;;  %v237_v33 = vadd.f32 %v600_v18, %v236_v31  ;;  %v301_v34 = vadd.f32 %v600_v18, %v300_v32 }
  0xe2   :  { %363 = vst.msk [vmem:[%s765_s3 + $0x18] sm:$0xff] %vm150_vm0, %v245_v29  ;;  %379 = vst.msk [vmem:[%s765_s3 + $0x98] sm:$0xff] %vm150_vm0, %v309_v30 }
  0xe3   :  { %361 = vst.msk [vmem:[%s765_s3 + $0x8] sm:$0xff] %vm150_vm0, %v237_v33  ;;  %377 = vst.msk [vmem:[%s765_s3 + $0x88] sm:$0xff] %vm150_vm0, %v301_v34 }
  0xe5   :  { %v459_v35 = vpop.f32.mrb[4].mxu0  ;;  %v475_v36 = vpop.f32.mrb[4].mxu1 }
  0xe6   :  { %v258_v37 = vadd.f32 %v459_v35, %v600_v18  ;;  %v322_v38 = vadd.f32 %v475_v36, %v600_v18  ;;  %v249_v39 = vpop.f32.mrb[5].mxu0  ;;  %v313_v40 = vpop.f32.mrb[5].mxu1 }
  0xe7   :  { %v250_v41 = vadd.f32 %v600_v18, %v249_v39  ;;  %v314_v42 = vadd.f32 %v600_v18, %v313_v40  ;;  %v460_v43 = vpop.f32.mrb[6].mxu0  ;;  %v476_v44 = vpop.f32.mrb[6].mxu1 }
  0xe8   :  { %366 = vst.msk [vmem:[%s765_s3 + $0x30] sm:$0xff] %vm150_vm0, %v258_v37  ;;  %382 = vst.msk [vmem:[%s765_s3 + $0xb0] sm:$0xff] %vm150_vm0, %v322_v38  ;;  %v261_v45 = vadd.f32 %v460_v43, %v600_v18  ;;  %v325_v46 = vadd.f32 %v476_v44, %v600_v18  ;;  %v252_v47 = vpop.f32.mrb[7].mxu0  ;;  %v316_v48 = vpop.f32.mrb[7].mxu1 }
  0xe9   :  { %364 = vst.msk [vmem:[%s765_s3 + $0x20] sm:$0xff] %vm150_vm0, %v250_v41  ;;  %380 = vst.msk [vmem:[%s765_s3 + $0xa0] sm:$0xff] %vm150_vm0, %v314_v42  ;;  %v253_v49 = vadd.f32 %v600_v18, %v252_v47  ;;  %v317_v50 = vadd.f32 %v600_v18, %v316_v48 }
  0xea   :  { %367 = vst.msk [vmem:[%s765_s3 + $0x38] sm:$0xff] %vm150_vm0, %v261_v45  ;;  %383 = vst.msk [vmem:[%s765_s3 + $0xb8] sm:$0xff] %vm150_vm0, %v325_v46 }
  0xeb   :  { %365 = vst.msk [vmem:[%s765_s3 + $0x28] sm:$0xff] %vm150_vm0, %v253_v49  ;;  %381 = vst.msk [vmem:[%s765_s3 + $0xa8] sm:$0xff] %vm150_vm0, %v317_v50 }
  0xed   :  { %v463_v51 = vpop.f32.mrb[8].mxu0  ;;  %v479_v52 = vpop.f32.mrb[8].mxu1 }
  0xee   :  { %v274_v53 = vadd.f32 %v463_v51, %v600_v18  ;;  %v338_v54 = vadd.f32 %v479_v52, %v600_v18  ;;  %v265_v55 = vpop.f32.mrb[9].mxu0  ;;  %v329_v56 = vpop.f32.mrb[9].mxu1 }
  0xef   :  { %v266_v57 = vadd.f32 %v600_v18, %v265_v55  ;;  %v330_v58 = vadd.f32 %v600_v18, %v329_v56  ;;  %v464_v59 = vpop.f32.mrb[10].mxu0  ;;  %v480_v60 = vpop.f32.mrb[10].mxu1 }
  0xf0   :  { %370 = vst.msk [vmem:[%s765_s3 + $0x50] sm:$0xff] %vm150_vm0, %v274_v53  ;;  %386 = vst.msk [vmem:[%s765_s3 + $0xd0] sm:$0xff] %vm150_vm0, %v338_v54  ;;  %v277_v61 = vadd.f32 %v464_v59, %v600_v18  ;;  %v341_v62 = vadd.f32 %v480_v60, %v600_v18  ;;  %v268_v63 = vpop.f32.mrb[11].mxu0  ;;  %v332_v0 = vpop.f32.mrb[11].mxu1 }
  0xf1   :  { %368 = vst.msk [vmem:[%s765_s3 + $0x40] sm:$0xff] %vm150_vm0, %v266_v57  ;;  %384 = vst.msk [vmem:[%s765_s3 + $0xc0] sm:$0xff] %vm150_vm0, %v330_v58  ;;  %v269_v1 = vadd.f32 %v600_v18, %v268_v63  ;;  %v333_v2 = vadd.f32 %v600_v18, %v332_v0 }
  0xf2   :  { %371 = vst.msk [vmem:[%s765_s3 + $0x58] sm:$0xff] %vm150_vm0, %v277_v61  ;;  %387 = vst.msk [vmem:[%s765_s3 + $0xd8] sm:$0xff] %vm150_vm0, %v341_v62 }
  0xf3   :  { %369 = vst.msk [vmem:[%s765_s3 + $0x48] sm:$0xff] %vm150_vm0, %v269_v1  ;;  %385 = vst.msk [vmem:[%s765_s3 + $0xc8] sm:$0xff] %vm150_vm0, %v333_v2 }
  0xf5   :  { %v467_v3 = vpop.f32.mrb[12].mxu0  ;;  %v483_v4 = vpop.f32.mrb[12].mxu1 }
  0xf6   :  { %v290_v5 = vadd.f32 %v467_v3, %v600_v18  ;;  %v354_v6 = vadd.f32 %v483_v4, %v600_v18  ;;  %v281_v7 = vpop.f32.mrb[13].mxu0  ;;  %v345_v8 = vpop.f32.mrb[13].mxu1 }
  0xf7   :  { %v282_v9 = vadd.f32 %v600_v18, %v281_v7  ;;  %v346_v10 = vadd.f32 %v600_v18, %v345_v8  ;;  %v468_v11 = vpop.f32.mrb[14].mxu0  ;;  %v484_v12 = vpop.f32.mrb[14].mxu1 }
  0xf8   :  { %374 = vst.msk [vmem:[%s765_s3 + $0x70] sm:$0xff] %vm150_vm0, %v290_v5  ;;  %390 = vst.msk [vmem:[%s765_s3 + $0xf0] sm:$0xff] %vm150_vm0, %v354_v6  ;;  %v293_v13 = vadd.f32 %v468_v11, %v600_v18  ;;  %v357_v14 = vadd.f32 %v484_v12, %v600_v18  ;;  %v284_v15 = vpop.f32.mrb[15].mxu0  ;;  %v348_v16 = vpop.f32.mrb[15].mxu1 }
  0xf9   :  { %372 = vst.msk [vmem:[%s765_s3 + $0x60] sm:$0xff] %vm150_vm0, %v282_v9  ;;  %388 = vst.msk [vmem:[%s765_s3 + $0xe0] sm:$0xff] %vm150_vm0, %v346_v10  ;;  %v285_v17 = vadd.f32 %v600_v18, %v284_v15  ;;  %v349_v19 = vadd.f32 %v600_v18, %v348_v16 }
  0xfa   :  { %375 = vst.msk [vmem:[%s765_s3 + $0x78] sm:$0xff] %vm150_vm0, %v293_v13  ;;  %391 = vst.msk [vmem:[%s765_s3 + $0xf8] sm:$0xff] %vm150_vm0, %v357_v14 }
  0xfb   :  { %373 = vst.msk [vmem:[%s765_s3 + $0x68] sm:$0xff] %vm150_vm0, %v285_v17  ;;  %389 = vst.msk [vmem:[%s765_s3 + $0xe8] sm:$0xff] %vm150_vm0, %v349_v19 }

// kernel: surgical_dino_forward.20
= control target key start
LH: loop header
LB: loop body
LE: loop exit
PB: predicated region body
PF: predicated region fallthrough
CT: control target
= control target key end

     0   :  { %vm375_vm0 = vcmask 261120   ;;  %s806_s1 = inlined_call_operand.vmem [shape: bf16[128,32], index: 1, kind: input, shape index: {}]   ;;  %s807_s0 = inlined_call_operand.vmem [shape: bf16[256,128], index: 0, kind: input, shape index: {}]   ;;  %s808_s2 = inlined_call_operand.vmem [shape: f32[1,32], index: 2, kind: input, shape index: {}]   ;;  %s809_s3 = inlined_call_operand.vmem [shape: f32[256,32], index: 3, kind: output, shape index: {}]  }
   0x1   :  { %v525_v0 = vld [vmem:[%s806_s1] sm:$0xff]   ;;  %v526_v1 = vld [vmem:[%s806_s1 + $0x8] sm:$0xff]   ;;  %v527_v2 = vld [vmem:[%s806_s1 + $0x10] sm:$0xff]  }
   0x2   :  { %461 = vmatprep.subr.bf16.mxu0 %v525_v0  ;;  %509 = vmatprep.subr.bf16.mxu1 %v525_v0  ;;  %v528_v3 = vld [vmem:[%s806_s1 + $0x18] sm:$0xff]   ;;  %v533_v4 = vld [vmem:[%s807_s0] sm:$0xff]   ;;  %v530_v7 = vld [vmem:[%s806_s1 + $0x28] sm:$0xff]  }
   0x3   :  { %462 = vmatpush3.bf16.msra.mxu0 %v525_v0  ;;  %517 = vmatpush3.bf16.msra.mxu1 %v525_v0  ;;  %v534_v5 = vld [vmem:[%s807_s0 + $0x40] sm:$0xff]   ;;  %v531_v8 = vld [vmem:[%s806_s1 + $0x30] sm:$0xff]   ;;  %v532_v9 = vld [vmem:[%s806_s1 + $0x38] sm:$0xff]  }
   0x4   :  { %463 = vmatprep.subr.bf16.mxu0 %v526_v1  ;;  %510 = vmatprep.subr.bf16.mxu1 %v526_v1  ;;  %v529_v6 = vld [vmem:[%s806_s1 + $0x20] sm:$0xff]   ;;  %v535_v10 = vld [vmem:[%s807_s0 + $0x8] sm:$0xff]   ;;  %v537_v12 = vld [vmem:[%s807_s0 + $0x10] sm:$0xff]  }
   0x5   :  { %477 = vmatprep.mubr.bf16.mxu0 %v533_v4  ;;  %493 = vmatprep.mubr.bf16.mxu1 %v534_v5  ;;  %v536_v11 = vld [vmem:[%s807_s0 + $0x48] sm:$0xff]   ;;  %v538_v13 = vld [vmem:[%s807_s0 + $0x50] sm:$0xff]   ;;  %v539_v14 = vld [vmem:[%s807_s0 + $0x18] sm:$0xff]  }
   0x6   :  { %v540_v15 = vld [vmem:[%s807_s0 + $0x58] sm:$0xff]   ;;  %v541_v16 = vld [vmem:[%s807_s0 + $0x20] sm:$0xff]   ;;  %v543_v18 = vld [vmem:[%s807_s0 + $0x28] sm:$0xff]  }
   0x7   :  { %464 = vmatpush3.bf16.msra.mxu0 %v526_v1  ;;  %518 = vmatpush3.bf16.msra.mxu1 %v526_v1  ;;  %v542_v17 = vld [vmem:[%s807_s0 + $0x60] sm:$0xff]   ;;  %v544_v19 = vld [vmem:[%s807_s0 + $0x68] sm:$0xff]   ;;  %v545_v20 = vld [vmem:[%s807_s0 + $0x30] sm:$0xff]  }
   0x8   :  { %465 = vmatprep.subr.bf16.mxu0 %v527_v2  ;;  %511 = vmatprep.subr.bf16.mxu1 %v527_v2  ;;  %v546_v21 = vld [vmem:[%s807_s0 + $0x70] sm:$0xff]   ;;  %v547_v22 = vld [vmem:[%s807_s0 + $0x38] sm:$0xff]   ;;  %v644_v24 = vld [vmem:[%s808_s2] ss:$0 sm:$0xff] }
   0x9   :  { %v548_v23 = vld [vmem:[%s807_s0 + $0x78] sm:$0xff]  }
   0xb   :  { %466 = vmatpush3.bf16.msra.mxu0 %v527_v2  ;;  %519 = vmatpush3.bf16.msra.mxu1 %v527_v2 }
   0xc   :  { %467 = vmatprep.subr.bf16.mxu0 %v528_v3  ;;  %512 = vmatprep.subr.bf16.mxu1 %v528_v3 }
   0xf   :  { %468 = vmatpush3.bf16.msra.mxu0 %v528_v3  ;;  %520 = vmatpush3.bf16.msra.mxu1 %v528_v3 }
  0x10   :  { %469 = vmatprep.subr.bf16.mxu0 %v529_v6  ;;  %513 = vmatprep.subr.bf16.mxu1 %v529_v6 }
  0x13   :  { %470 = vmatpush3.bf16.msra.mxu0 %v529_v6  ;;  %521 = vmatpush3.bf16.msra.mxu1 %v529_v6 }
  0x14   :  { %471 = vmatprep.subr.bf16.mxu0 %v530_v7  ;;  %514 = vmatprep.subr.bf16.mxu1 %v530_v7 }
  0x17   :  { %472 = vmatpush3.bf16.msra.mxu0 %v530_v7  ;;  %522 = vmatpush3.bf16.msra.mxu1 %v530_v7 }
  0x18   :  { %473 = vmatprep.subr.bf16.mxu0 %v531_v8  ;;  %515 = vmatprep.subr.bf16.mxu1 %v531_v8 }
  0x1b   :  { %474 = vmatpush3.bf16.msra.mxu0 %v531_v8  ;;  %523 = vmatpush3.bf16.msra.mxu1 %v531_v8 }
  0x1c   :  { %475 = vmatprep.subr.bf16.mxu0 %v532_v9  ;;  %516 = vmatprep.subr.bf16.mxu1 %v532_v9 }
  0x1f   :  { %476 = vmatpush3.bf16.msra.mxu0 %v532_v9  ;;  %524 = vmatpush3.bf16.msra.mxu1 %v532_v9 }
  0x22   :  { %478 = vmatmul.mubr.bf16.vlgmr.msra.gmra.mrb[0].mxu0 %v535_v10  ;;  %494 = vmatmul.mubr.bf16.vlgmr.msra.gmra.mrb[0].mxu1 %v536_v11 }
  0x23   :  { %481 = vmatprep.mubr.bf16.mxu0 %v537_v12  ;;  %497 = vmatprep.mubr.bf16.mxu1 %v538_v13 }
  0x2a   :  { %482 = vmatmul.mubr.bf16.gmra.mrb[4].mxu0 %v539_v14  ;;  %498 = vmatmul.mubr.bf16.gmra.mrb[4].mxu1 %v540_v15 }
  0x2b   :  { %485 = vmatprep.mubr.bf16.mxu0 %v541_v16  ;;  %501 = vmatprep.mubr.bf16.mxu1 %v542_v17 }
  0x32   :  { %486 = vmatmul.mubr.bf16.gmra.mrb[8].mxu0 %v543_v18  ;;  %502 = vmatmul.mubr.bf16.gmra.mrb[8].mxu1 %v544_v19 }
  0x33   :  { %489 = vmatprep.mubr.bf16.mxu0 %v545_v20  ;;  %505 = vmatprep.mubr.bf16.mxu1 %v546_v21 }
  0x3a   :  { %490 = vmatmul.mubr.bf16.gmra.mrb[12].mxu0 %v547_v22  ;;  %506 = vmatmul.mubr.bf16.gmra.mrb[12].mxu1 %v548_v23 }
  0xf5   :  { %v479_v25 = vpop.f32.mrb[0].mxu0  ;;  %v495_v26 = vpop.f32.mrb[0].mxu1 }
  0xf6   :  { %v257_v27 = vadd.f32 %v479_v25, %v644_v24  ;;  %v321_v28 = vadd.f32 %v495_v26, %v644_v24  ;;  %v248_v29 = vpop.f32.mrb[1].mxu0  ;;  %v312_v30 = vpop.f32.mrb[1].mxu1 }
  0xf7   :  { %v249_v31 = vadd.f32 %v644_v24, %v248_v29  ;;  %v313_v32 = vadd.f32 %v644_v24, %v312_v30  ;;  %v480_v33 = vpop.f32.mrb[2].mxu0  ;;  %v496_v34 = vpop.f32.mrb[2].mxu1 }
  0xf8   :  { %378 = vst.msk [vmem:[%s809_s3 + $0x10] sm:$0xff] %vm375_vm0, %v257_v27  ;;  %394 = vst.msk [vmem:[%s809_s3 + $0x90] sm:$0xff] %vm375_vm0, %v321_v28  ;;  %v260_v35 = vadd.f32 %v480_v33, %v644_v24  ;;  %v324_v36 = vadd.f32 %v496_v34, %v644_v24  ;;  %v251_v37 = vpop.f32.mrb[3].mxu0  ;;  %v315_v38 = vpop.f32.mrb[3].mxu1 }
  0xf9   :  { %376 = vst.msk [vmem:[%s809_s3] sm:$0xff] %vm375_vm0, %v249_v31  ;;  %392 = vst.msk [vmem:[%s809_s3 + $0x80] sm:$0xff] %vm375_vm0, %v313_v32  ;;  %v252_v39 = vadd.f32 %v644_v24, %v251_v37  ;;  %v316_v40 = vadd.f32 %v644_v24, %v315_v38 }
  0xfa   :  { %379 = vst.msk [vmem:[%s809_s3 + $0x18] sm:$0xff] %vm375_vm0, %v260_v35  ;;  %395 = vst.msk [vmem:[%s809_s3 + $0x98] sm:$0xff] %vm375_vm0, %v324_v36 }
  0xfb   :  { %377 = vst.msk [vmem:[%s809_s3 + $0x8] sm:$0xff] %vm375_vm0, %v252_v39  ;;  %393 = vst.msk [vmem:[%s809_s3 + $0x88] sm:$0xff] %vm375_vm0, %v316_v40 }
  0xfd   :  { %v483_v41 = vpop.f32.mrb[4].mxu0  ;;  %v499_v42 = vpop.f32.mrb[4].mxu1 }
  0xfe   :  { %v273_v43 = vadd.f32 %v483_v41, %v644_v24  ;;  %v337_v44 = vadd.f32 %v499_v42, %v644_v24  ;;  %v264_v45 = vpop.f32.mrb[5].mxu0  ;;  %v328_v46 = vpop.f32.mrb[5].mxu1 }
  0xff   :  { %v265_v47 = vadd.f32 %v644_v24, %v264_v45  ;;  %v329_v48 = vadd.f32 %v644_v24, %v328_v46  ;;  %v484_v49 = vpop.f32.mrb[6].mxu0  ;;  %v500_v50 = vpop.f32.mrb[6].mxu1 }
 0x100   :  { %382 = vst.msk [vmem:[%s809_s3 + $0x30] sm:$0xff] %vm375_vm0, %v273_v43  ;;  %398 = vst.msk [vmem:[%s809_s3 + $0xb0] sm:$0xff] %vm375_vm0, %v337_v44  ;;  %v276_v51 = vadd.f32 %v484_v49, %v644_v24  ;;  %v340_v52 = vadd.f32 %v500_v50, %v644_v24  ;;  %v267_v53 = vpop.f32.mrb[7].mxu0  ;;  %v331_v54 = vpop.f32.mrb[7].mxu1 }
 0x101   :  { %380 = vst.msk [vmem:[%s809_s3 + $0x20] sm:$0xff] %vm375_vm0, %v265_v47  ;;  %396 = vst.msk [vmem:[%s809_s3 + $0xa0] sm:$0xff] %vm375_vm0, %v329_v48  ;;  %v268_v55 = vadd.f32 %v644_v24, %v267_v53  ;;  %v332_v56 = vadd.f32 %v644_v24, %v331_v54 }
 0x102   :  { %383 = vst.msk [vmem:[%s809_s3 + $0x38] sm:$0xff] %vm375_vm0, %v276_v51  ;;  %399 = vst.msk [vmem:[%s809_s3 + $0xb8] sm:$0xff] %vm375_vm0, %v340_v52 }
 0x103   :  { %381 = vst.msk [vmem:[%s809_s3 + $0x28] sm:$0xff] %vm375_vm0, %v268_v55  ;;  %397 = vst.msk [vmem:[%s809_s3 + $0xa8] sm:$0xff] %vm375_vm0, %v332_v56 }
 0x105   :  { %v487_v57 = vpop.f32.mrb[8].mxu0  ;;  %v503_v58 = vpop.f32.mrb[8].mxu1 }
 0x106   :  { %v289_v59 = vadd.f32 %v487_v57, %v644_v24  ;;  %v353_v60 = vadd.f32 %v503_v58, %v644_v24  ;;  %v280_v61 = vpop.f32.mrb[9].mxu0  ;;  %v344_v62 = vpop.f32.mrb[9].mxu1 }
 0x107   :  { %v281_v63 = vadd.f32 %v644_v24, %v280_v61  ;;  %v345_v0 = vadd.f32 %v644_v24, %v344_v62  ;;  %v488_v1 = vpop.f32.mrb[10].mxu0  ;;  %v504_v2 = vpop.f32.mrb[10].mxu1 }
 0x108   :  { %386 = vst.msk [vmem:[%s809_s3 + $0x50] sm:$0xff] %vm375_vm0, %v289_v59  ;;  %402 = vst.msk [vmem:[%s809_s3 + $0xd0] sm:$0xff] %vm375_vm0, %v353_v60  ;;  %v292_v3 = vadd.f32 %v488_v1, %v644_v24  ;;  %v356_v4 = vadd.f32 %v504_v2, %v644_v24  ;;  %v283_v5 = vpop.f32.mrb[11].mxu0  ;;  %v347_v6 = vpop.f32.mrb[11].mxu1 }
 0x109   :  { %384 = vst.msk [vmem:[%s809_s3 + $0x40] sm:$0xff] %vm375_vm0, %v281_v63  ;;  %400 = vst.msk [vmem:[%s809_s3 + $0xc0] sm:$0xff] %vm375_vm0, %v345_v0  ;;  %v284_v7 = vadd.f32 %v644_v24, %v283_v5  ;;  %v348_v8 = vadd.f32 %v644_v24, %v347_v6 }
 0x10a   :  { %387 = vst.msk [vmem:[%s809_s3 + $0x58] sm:$0xff] %vm375_vm0, %v292_v3  ;;  %403 = vst.msk [vmem:[%s809_s3 + $0xd8] sm:$0xff] %vm375_vm0, %v356_v4 }
 0x10b   :  { %385 = vst.msk [vmem:[%s809_s3 + $0x48] sm:$0xff] %vm375_vm0, %v284_v7  ;;  %401 = vst.msk [vmem:[%s809_s3 + $0xc8] sm:$0xff] %vm375_vm0, %v348_v8 }
 0x10d   :  { %v491_v9 = vpop.f32.mrb[12].mxu0  ;;  %v507_v10 = vpop.f32.mrb[12].mxu1 }
 0x10e   :  { %v305_v11 = vadd.f32 %v491_v9, %v644_v24  ;;  %v369_v12 = vadd.f32 %v507_v10, %v644_v24  ;;  %v296_v13 = vpop.f32.mrb[13].mxu0  ;;  %v360_v14 = vpop.f32.mrb[13].mxu1 }
 0x10f   :  { %v297_v15 = vadd.f32 %v644_v24, %v296_v13  ;;  %v361_v16 = vadd.f32 %v644_v24, %v360_v14  ;;  %v492_v17 = vpop.f32.mrb[14].mxu0  ;;  %v508_v18 = vpop.f32.mrb[14].mxu1 }
 0x110   :  { %390 = vst.msk [vmem:[%s809_s3 + $0x70] sm:$0xff] %vm375_vm0, %v305_v11  ;;  %406 = vst.msk [vmem:[%s809_s3 + $0xf0] sm:$0xff] %vm375_vm0, %v369_v12  ;;  %v308_v19 = vadd.f32 %v492_v17, %v644_v24  ;;  %v372_v20 = vadd.f32 %v508_v18, %v644_v24  ;;  %v299_v21 = vpop.f32.mrb[15].mxu0  ;;  %v363_v22 = vpop.f32.mrb[15].mxu1 }
 0x111   :  { %388 = vst.msk [vmem:[%s809_s3 + $0x60] sm:$0xff] %vm375_vm0, %v297_v15  ;;  %404 = vst.msk [vmem:[%s809_s3 + $0xe0] sm:$0xff] %vm375_vm0, %v361_v16  ;;  %v300_v23 = vadd.f32 %v644_v24, %v299_v21  ;;  %v364_v25 = vadd.f32 %v644_v24, %v363_v22 }
 0x112   :  { %391 = vst.msk [vmem:[%s809_s3 + $0x78] sm:$0xff] %vm375_vm0, %v308_v19  ;;  %407 = vst.msk [vmem:[%s809_s3 + $0xf8] sm:$0xff] %vm375_vm0, %v372_v20 }
 0x113   :  { %389 = vst.msk [vmem:[%s809_s3 + $0x68] sm:$0xff] %vm375_vm0, %v300_v23  ;;  %405 = vst.msk [vmem:[%s809_s3 + $0xe8] sm:$0xff] %vm375_vm0, %v364_v25 }

// kernel: squeeze.35
= control target key start
LH: loop header
LB: loop body
LE: loop exit
PB: predicated region body
PF: predicated region fallthrough
CT: control target
= control target key end

     0   :  { %vm259_vm0 = vcmask 1047556   ;;  %vm261_vm1 = vcmask 261120   ;;  %s403_s14 = smov 32   ;;  %s404_s15 = smov 64   ;;  %vm280_vm2 = vcmask 1048320   ;;  %vm301_vm3 = vcmask 785920   ;;  %s440_s0 = inlined_call_operand.vmem [shape: bf16[4,32,16], index: 0, kind: input, shape index: {}]   ;;  %s441_s1 = inlined_call_operand.vmem [shape: bf16[128,16], index: 1, kind: output, shape index: {}]  }
   0x1   :  { %v363_v0 = vld [vmem:[%s440_s0 + $0x18] sm:$0xff]   ;;  %v367_v1 = vld [vmem:[%s440_s0 + $0x10] sm:$0xff]   ;;  %v371_v2 = vld [vmem:[%s440_s0 + $0x8] sm:$0xff]   ;;  %vm322_vm4 = vcmask 523520  }
   0x2   :  { %v17_v3 = vunpack.c.h.bf16 %v363_v0  ;;  %v49_v4 = vunpack.c.l.bf16 %v363_v0  ;;  %v375_v5 = vld [vmem:[%s440_s0] sm:$0xff]   ;;  %v81_v6 = vunpack.c.h.bf16 %v367_v1  ;;  %v113_v7 = vunpack.c.l.bf16 %v367_v1  ;;  %s402_s0 = smov 96  }
   0x3   :  { %v145_v8 = vunpack.c.h.bf16 %v371_v2  ;;  %v177_v9 = vunpack.c.l.bf16 %v371_v2  ;;  %v209_v10 = vunpack.c.h.bf16 %v375_v5  ;;  %v240_v11 = vunpack.c.l.bf16 %v375_v5 }
   0x4   :  { %20 = vst [vmem:[#allocation1 + $0x70] ss:$8 sps:$4 sm:$0xff] %v17_v3   ;;  %52 = vst [vmem:[#allocation1 + $0x60] ss:$8 sps:$4 sm:$0xff] %v49_v4  }
   0x5   :  { %84 = vst [vmem:[#allocation1 + $0x50] ss:$8 sps:$4 sm:$0xff] %v81_v6   ;;  %116 = vst [vmem:[#allocation1 + $0x40] ss:$8 sps:$4 sm:$0xff] %v113_v7  }
   0x6   :  { %148 = vst [vmem:[#allocation1 + $0x30] ss:$8 sps:$4 sm:$0xff] %v145_v8   ;;  %180 = vst [vmem:[#allocation1 + $0x20] ss:$8 sps:$4 sm:$0xff] %v177_v9  }
   0x7   :  { %212 = vst [vmem:[#allocation1 + $0x10] ss:$8 sps:$4 sm:$0xff] %v209_v10   ;;  %243 = vst [vmem:[#allocation1] ss:$8 sps:$4 sm:$0xff] %v240_v11  }
   0xb   :  { %v285_v12 = vld [vmem:[#allocation1 + $0x43] ss:$8 sm:$0xf0]   ;;  %v306_v13 = vld [vmem:[#allocation1 + $0x42] ss:$8 sm:$0xf0]  }
   0xc   :  { %v283_v14 = vld [vmem:[#allocation1 + $0x43] ss:$8 sm:$0xf]   ;;  %v304_v15 = vld [vmem:[#allocation1 + $0x42] ss:$8 sm:$0xf]  }
   0xd   :  { %v275_v16 = vld [vmem:[#allocation1 + $0x3] ss:$8 sm:$0xf0]   ;;  %v287_v17 = vsel %vm259_vm0, %v285_v12, %v283_v14  ;;  %v296_v18 = vld [vmem:[#allocation1 + $0x2] ss:$8 sm:$0xf0]   ;;  %v308_v23 = vsel %vm259_vm0, %v306_v13, %v304_v15 }
   0xe   :  { %v273_v19 = vld [vmem:[#allocation1 + $0x3] ss:$8 sm:$0xf]   ;;  %v294_v20 = vld [vmem:[#allocation1 + $0x2] ss:$8 sm:$0xf]  }
   0xf   :  { %v277_v21 = vsel %vm259_vm0, %v275_v16, %v273_v19  ;;  %v298_v22 = vsel %vm259_vm0, %v296_v18, %v294_v20  ;;  %v315_v24 = vld [vmem:[#allocation1 + $0x1] ss:$8 sm:$0xf]   ;;  %v257_v31 = vld [vmem:[#allocation1] ss:$8 sm:$0xf]  }
  0x10   :  { %v317_v25 = vld [vmem:[#allocation1 + $0x1] ss:$8 sm:$0xf0]   ;;  %v387_v26 = vpack.i.bf16 %v287_v17, %v277_v21  ;;  %v258_v32 = vld [vmem:[#allocation1] ss:$8 sm:$0xf0]   ;;  %v392_v33 = vpack.i.bf16 %v308_v23, %v298_v22 }
  0x11   :  { %v319_v27 = vsel %vm259_vm0, %v317_v25, %v315_v24  ;;  %v325_v28 = vld [vmem:[#allocation1 + $0x41] ss:$8 sm:$0xf]   ;;  %v260_v35 = vsel %vm259_vm0, %v258_v32, %v257_v31  ;;  %v264_v36 = vld [vmem:[#allocation1 + $0x40] ss:$8 sm:$0xf]  }
  0x12   :  { %v327_v29 = vld [vmem:[#allocation1 + $0x41] ss:$8 sm:$0xf0]   ;;  %388 = vrot.lane.b32.xlu0 %v387_v26, %s402_s0  ;;  %v266_v37 = vld [vmem:[#allocation1 + $0x40] ss:$8 sm:$0xf0]  }
  0x13   :  { %v329_v30 = vsel %vm259_vm0, %v327_v29, %v325_v28  ;;  %262 = vst.msk [vmem:[#allocation0] sm:$0xff] %vm261_vm1, %v260_v35   ;;  %v268_v38 = vsel %vm259_vm0, %v266_v37, %v264_v36 }
  0x14   :  { %v397_v34 = vpack.i.bf16 %v329_v30, %v319_v27  ;;  %271 = vst.msk [vmem:[#allocation0 + $0x8] sm:$0xff] %vm261_vm1, %v268_v38  }
  0x16   :  { %398 = vrot.lane.b32.xlu1 %v397_v34, %s403_s14  ;;  %393 = vrot.lane.b32.xlu0 %v392_v33, %s404_s15 }
  0x84   :  { %v389_v39 = vpop.permute.xlu0 %388 }
  0x85   :  { %v391_v40 = vunpack.i.h.bf16 %v389_v39  ;;  %v390_v41 = vunpack.i.l.bf16 %v389_v39 }
  0x87   :  { %281 = vst.msk [vmem:[#allocation0] sm:$0xff] %vm280_vm2, %v390_v41   ;;  %292 = vst.msk [vmem:[#allocation0 + $0x8] sm:$0xff] %vm280_vm2, %v391_v40  }
  0x88   :  { %v399_v42 = vpop.permute.xlu1 %398  ;;  %v394_v43 = vpop.permute.xlu0 %393 }
  0x89   :  { %v401_v44 = vunpack.i.h.bf16 %v399_v42  ;;  %v400_v45 = vunpack.i.l.bf16 %v399_v42  ;;  %v396_v46 = vunpack.i.h.bf16 %v394_v43  ;;  %v395_v47 = vunpack.i.l.bf16 %v394_v43 }
  0x8b   :  { %302 = vst.msk [vmem:[#allocation0] sm:$0xff] %vm301_vm3, %v395_v47   ;;  %313 = vst.msk [vmem:[#allocation0 + $0x8] sm:$0xff] %vm301_vm3, %v396_v46  }
  0x8c   :  { %323 = vst.msk [vmem:[#allocation0] sm:$0xff] %vm322_vm4, %v400_v45   ;;  %334 = vst.msk [vmem:[#allocation0 + $0x8] sm:$0xff] %vm322_vm4, %v401_v44  }
  0x93   :  { %v339_v48 = vld [vmem:[#allocation0] sm:$0xff]  ;;  %v344_v49 = vld [vmem:[#allocation0 + $0x8] sm:$0xff] }
  0x94   :  { %v382_v50 = vpack.c.bf16 %v344_v49, %v339_v48 }
  0x96   :  { %383 = vst [vmem:[%s441_s1] sm:$0xff] %v382_v50  }

// kernel: surgical_dino_forward.33
= control target key start
LH: loop header
LB: loop body
LE: loop exit
PB: predicated region body
PF: predicated region fallthrough
CT: control target
= control target key end

     0   :  { %s710_s15 = smov 0   ;;  %s712_s16 = smov 0   ;;  %s778_s0 = inlined_call_operand.vmem [shape: bf16[2,128,256], index: 0, kind: input, shape index: {}]   ;;  %s779_s1 = inlined_call_operand.vmem [shape: bf16[16,128], index: 1, kind: input, shape index: {}]   ;;  %s780_s2 = inlined_call_operand.vmem [shape: f32[2,16,1], index: 2, kind: input, shape index: {}]   ;;  %s781_s3 = inlined_call_operand.vmem [shape: f32[16,1], index: 3, kind: input, shape index: {}]   ;;  %s782_s4 = inlined_call_operand.vmem [shape: f32[2,1,256], index: 4, kind: output, shape index: {}]  }
   0x1   :  { %s714_s17 = smov 0  }
   0x2 LB: > { %s26_s18 = sadd.s32 1, %s677_s16  ;;  %p575_p0 = scmp.ge.s32.totalorder %s681_s17, 1  ;;  %s681_s17 = sphi %s714_s17, %s14_s17   ;;  %s677_s16 = sphi %s712_s16, %s784_s16   ;;  %s673_s15 = sphi %s710_s15, %s783_s15  }
   0x3   : > { %p28_p1 = scmp.ge.s32.totalorder %s26_s18, 2  ;;  %p193_p2 = scmp.lt.s32.totalorder %s681_s17, 3 }
   0x5   : > { %s786_s18 = smov (%p28_p1, %s26_s18), 0  ;;  %p194_p3 = pnand %p575_p0, %p193_p2 }
   0x6   : > { %p229_p4 = scmp.lt.s32.totalorder (!%p194_p3), %s673_s15, 1  ;;  %v683_v0 = vmov (!%p194_p3), 0   ;;  %v431_v1 = vld [vmem:[%s781_s3] sm:$0xff] (!%p194_p3)  ;;  %v432_v2 = vld [vmem:[%s781_s3 + $0x8] sm:$0xff] (!%p194_p3) }
   0x7   : > { %197 = sbr.rel (%p194_p3) target bundleno = 305 (0x131), region = 36  ;;  %398 = vmatprep.mubr.bf16.mxu0 (!%p194_p3), %v683_v0  ;;  %628 = vset.pattern.permute.xlu0 (!%p194_p3), %v683_v0  ;;  %v654_v21 = vld [vmem:[%s779_s1] sm:$0xff] (!%p194_p3)  }
   0x8   : > { %629 = vset.pattern.permute.xlu1 (!%p194_p3), %v683_v0 }
   0x9   : > { %435 = vperm.xlu1 (!%p194_p3), %629, %v431_v1  }
   0xd   : > { %440 = vperm.xlu1 (!%p194_p3), %629, %v432_v2  }
   0xe   : > { %s788_s15 = smov (!%p229_p4, %s673_s15), 1 }
   0xf   : > { %s600_s21 = sshll.u32 %s788_s15, 7  ;;  %s601_s27 = sshll.u32 %s788_s15, 4 }
  0x10   : > { %s740_s26 = scalar_lea.vmem %s778_s0, %s600_s21  ;;  %s242_s30 = scalar_lea.vmem %s780_s2, %s601_s27 }
  0x11   : > { %v630_v3 = vld [vmem:[%s740_s26 + $0x4] ss:$8 sps:$4 sm:$0xff]   ;;  %v632_v4 = vld [vmem:[%s740_s26] ss:$8 sps:$4 sm:$0xff]   ;;  %v633_v5 = vld [vmem:[%s740_s26 + $0x14] ss:$8 sps:$4 sm:$0xff]  }
  0x12   : > { %366 = vmatprep.subr.bf16.mxu0 %v630_v3  ;;  %v635_v6 = vld [vmem:[%s740_s26 + $0x10] ss:$8 sps:$4 sm:$0xff]   ;;  %v636_v7 = vld [vmem:[%s740_s26 + $0x24] ss:$8 sps:$4 sm:$0xff]   ;;  %v638_v8 = vld [vmem:[%s740_s26 + $0x20] ss:$8 sps:$4 sm:$0xff]  }
  0x13   : > { %367 = vmatpush1.bf16.msra.mxu0 %v632_v4  ;;  %v639_v9 = vld [vmem:[%s740_s26 + $0x34] ss:$8 sps:$4 sm:$0xff]   ;;  %v268_v10 = vld [vmem:[%s242_s30] sm:$0xff]  ;;  %v641_v11 = vld [vmem:[%s740_s26 + $0x30] ss:$8 sps:$4 sm:$0xff]   ;;  %s580_s7 = sshll.u32 %s788_s15, 1 }
  0x14   : > { %368 = vmatprep.subr.bf16.mxu0 %v633_v5  ;;  %272 = vperm.xlu0 %628, %v268_v10   ;;  %v642_v12 = vld [vmem:[%s740_s26 + $0x44] ss:$8 sps:$4 sm:$0xff]   ;;  %v644_v14 = vld [vmem:[%s740_s26 + $0x40] ss:$8 sps:$4 sm:$0xff]   ;;  %v645_v15 = vld [vmem:[%s740_s26 + $0x54] ss:$8 sps:$4 sm:$0xff]   ;;  %s247_s10 = scalar_lea.vmem %s782_s4, %s580_s7 }
  0x15   : > { %v269_v13 = vld [vmem:[%s242_s30 + $0x8] sm:$0xff]  ;;  %v647_v16 = vld [vmem:[%s740_s26 + $0x50] ss:$8 sps:$4 sm:$0xff]   ;;  %v651_v19 = vld [vmem:[%s740_s26 + $0x74] ss:$8 sps:$4 sm:$0xff]  }
  0x16   : > { %v648_v17 = vld [vmem:[%s740_s26 + $0x64] ss:$8 sps:$4 sm:$0xff]   ;;  %v650_v18 = vld [vmem:[%s740_s26 + $0x60] ss:$8 sps:$4 sm:$0xff]   ;;  %v653_v20 = vld [vmem:[%s740_s26 + $0x70] ss:$8 sps:$4 sm:$0xff]  }
  0x17   : > { %369 = vmatpush1.bf16.msra.mxu0 %v635_v6  ;;  %v684_v6 = vmov 1966171168  }
  0x18   : > { %370 = vmatprep.subr.bf16.mxu0 %v636_v7  ;;  %277 = vperm.xlu0 %628, %v269_v13   ;;  %v469_v7 = vunpack.c.l.s4 %v684_v6 }
  0x1b   : > { %371 = vmatpush1.bf16.msra.mxu0 %v638_v8  ;;  %v471_v8 = vlaneseq }
  0x1c   : > { %372 = vmatprep.subr.bf16.mxu0 %v639_v9 }
  0x1d   : > { %vm485_vm0 = vcmp.lt.s32.totalorder %v471_v8, 256 }
  0x1f   : > { %373 = vmatpush1.bf16.msra.mxu0 %v641_v11  ;;  %v470_v11 = vunpack.c.0.s8 %v469_v7 }
  0x20   : > { %374 = vmatprep.subr.bf16.mxu0 %v642_v12  ;;  %v472_v12 = vshrl.u32 %v471_v8, 7 }
  0x23   : > { %375 = vmatpush1.bf16.msra.mxu0 %v644_v14 }
  0x24   : > { %376 = vmatprep.subr.bf16.mxu0 %v645_v15 }
  0x27   : > { %377 = vmatpush1.bf16.msra.mxu0 %v647_v16 }
  0x28   : > { %378 = vmatprep.subr.bf16.mxu0 %v648_v17 }
  0x2b   : > { %379 = vmatpush1.bf16.msra.mxu0 %v650_v18  ;;  %v473_v18 = vsub.s32 %v470_v11, %v472_v12 }
  0x2c   : > { %380 = vmatprep.subr.bf16.mxu0 %v651_v19 }
  0x2f   : > { %381 = vmatpush1.bf16.msra.mxu0 %v653_v20 }
  0x32   : > { %399 = vmatmul.mubr.bf16.vlgmr.msra.gmra.mrb[0].mxu0 %v654_v21 }
  0x88   : > { %v436_v24 = vpop.permute.xlu1 %435 }
  0x8c   : > { %v441_v39 = vpop.permute.xlu1 %440 }
  0x93   : > { %v273_v22 = vpop.permute.xlu0 %272 }
  0x97   : > { %v278_v27 = vpop.permute.xlu0 %277 }
 0x105   : > { %v400_v23 = vpop.f32.mrb[0].mxu0 }
 0x106   : > { %v401_v25 = vadd.f32 %v400_v23, %v273_v22  ;;  %v402_v26 = vpop.f32.mrb[1].mxu0 }
 0x107   : > { %v403_v28 = vadd.f32 %v402_v26, %v273_v22  ;;  %v404_v29 = vpop.f32.mrb[2].mxu0 }
 0x108   : > { %v409_v30 = vmax.f32 %v401_v25, 0.0  ;;  %v405_v31 = vadd.f32 %v404_v29, %v278_v27  ;;  %v406_v32 = vpop.f32.mrb[3].mxu0 }
 0x109   : > { %v410_v33 = vmax.f32 %v403_v28, 0.0  ;;  %v407_v34 = vadd.f32 %v406_v32, %v278_v27 }
 0x10a   : > { %v413_v35 = vadd.f32 0.1, %v409_v30  ;;  %v411_v36 = vmax.f32 %v405_v31, 0.0 }
 0x10b   : > { %v414_v37 = vadd.f32 0.1, %v410_v33  ;;  %v412_v38 = vmax.f32 %v407_v34, 0.0 }
 0x10c   : > { %v415_v40 = vadd.f32 0.1, %v411_v36  ;;  %v443_v43 = vmul.f32 %v436_v24, %v413_v35 }
 0x10d   : > { %v416_v41 = vadd.f32 0.1, %v412_v38  ;;  %v444_v46 = vmul.f32 %v436_v24, %v414_v37 }
 0x10e   : > { %v417_v42 = vadd.f32 %v415_v40, %v413_v35  ;;  %v445_v44 = vmul.f32 %v441_v39, %v415_v40 }
 0x10f   : > { %v424_v45 = vadd.f32 %v416_v41, %v414_v37  ;;  %v446_v47 = vmul.f32 %v441_v39, %v416_v41 }
 0x110   : > { %v418_v48 = vrot.slane %v417_v42, 4  ;;  %v447_v49 = vadd.f32 %v445_v44, %v443_v43 }
 0x111   : > { %v425_v50 = vrot.slane %v424_v45, 4  ;;  %v454_v51 = vadd.f32 %v446_v47, %v444_v46 }
 0x112   : > { %v419_v52 = vadd.f32 %v418_v48, %v417_v42  ;;  %v448_v53 = vrot.slane %v447_v49, 4 }
 0x113   : > { %v426_v54 = vadd.f32 %v425_v50, %v424_v45  ;;  %v455_v55 = vrot.slane %v454_v51, 4 }
 0x114   : > { %v420_v56 = vrot.slane %v419_v52, 2  ;;  %v449_v58 = vadd.f32 %v448_v53, %v447_v49 }
 0x115   : > { %v427_v57 = vrot.slane %v426_v54, 2  ;;  %v456_v60 = vadd.f32 %v455_v55, %v454_v51 }
 0x116   : > { %v421_v59 = vadd.f32 %v420_v56, %v419_v52  ;;  %v450_v0 = vrot.slane %v449_v58, 2 }
 0x117   : > { %v428_v61 = vadd.f32 %v427_v57, %v426_v54  ;;  %v457_v2 = vrot.slane %v456_v60, 2 }
 0x118   : > { %v422_v62 = vrot.slane %v421_v59, 1  ;;  %v451_v4 = vadd.f32 %v450_v0, %v449_v58 }
 0x119   : > { %v429_v63 = vrot.slane %v428_v61, 1  ;;  %v458_v5 = vadd.f32 %v457_v2, %v456_v60 }
 0x11a   : > { %v423_v1 = vadd.f32 %v422_v62, %v421_v59  ;;  %v452_v9 = vrot.slane %v451_v4, 1 }
 0x11b   : > { %v430_v3 = vadd.f32 %v429_v63, %v428_v61  ;;  %v459_v10 = vrot.slane %v458_v5, 1 }
 0x11c   : > { %655 = vrcp.f32 %v423_v1  ;;  %v453_v13 = vadd.f32 %v452_v9, %v451_v4 }
 0x11d   : > { %657 = vrcp.f32 %v430_v3  ;;  %v460_v15 = vadd.f32 %v459_v10, %v458_v5 }
 0x126   : > { %v656_v14 = vpop.eup %655 }
 0x127   : > { %v658_v16 = vpop.eup %657  ;;  %v462_v17 = vmul.f32 %v656_v14, %v453_v13 }
 0x128   : > { %v464_v19 = vmul.f32 %v658_v16, %v460_v15 }
 0x12a   : > { %v467_v20 = vcombine.low %v462_v17, %v464_v19 }
 0x12c   : > { %v474_v21 = vrot.slane %v467_v20, %v473_v18 }
 0x12e   : > { %v481_v22 = vrot.slane %v474_v21, %v473_v18 }
 0x130   : > { %487 = vst.msk [vmem:[%s247_s10] sm:$0x3] %vm485_vm0, %v481_v22 }
 0x131 PF: > { %s14_s17 = sadd.s32 1, %s681_s17   ;;  %s783_s15 = smov %s677_s16 }
 0x132   : > { %p11_p5 = scmp.ge.s32.totalorder %s14_s17, 4   ;;  %s784_s16 = smov %s786_s18 }
 0x134   :  { %13 = sbr.rel (!%p11_p5) target bundleno = 2 (0x2), region = 69 }

</bundles_post_ra>
